<compile_context>
chip_gen: v6e
topology: v6e:2x2x1
jax: 0.10.0
libtpu: 0.0.40
codegen_flags: <defaults>
</compile_context>

<pallas_src>
import functools
import math

import jax
import jax.numpy as jnp
from jax.experimental import pallas as pl
from jax.experimental.pallas import tpu as pltpu


# ---------------------------------------------------------------------------
# Helpers
# ---------------------------------------------------------------------------
def _layernorm(x, g, b, eps=1e-5):
    mu = jnp.mean(x, axis=-1, keepdims=True)
    var = jnp.mean((x - mu) ** 2, axis=-1, keepdims=True)
    return (x - mu) * jax.lax.rsqrt(var + eps) * g + b


def _round_up(x, m):
    return (x + m - 1) // m * m


def _pick_batch_block(B, max_block=8):
    """Largest divisor of B (<= max_block) that still leaves >= 2 grid blocks
    along the batch axis (keeps both v7x TensorCores busy)."""
    if B <= 1:
        return 1
    best = 1
    for bt in range(1, min(max_block, B) + 1):
        if B % bt == 0 and (B // bt) >= 2:
            best = bt
    return best


LAYER_PARAM_KEYS = ("ln1_g", "ln1_b", "wqkv", "bqkv", "wo", "bo",
                    "ln2_g", "ln2_b", "w1", "b1", "w2", "b2")


def prepare_params(params, *, num_heads):
    """Kernel-ready parameter layout:
       * fold 1/sqrt(head_dim) into the q columns of wqkv / bqkv,
       * reshape wo to head-major (L, H, hd, D) so the attention-output concat
         can be folded into per-head projection matmuls."""
    p = dict(params)
    L, D, _ = params["wqkv"].shape
    hd = D // num_heads
    scale = 1.0 / math.sqrt(hd)

    wqkv = params["wqkv"].astype(jnp.float32)
    wqkv = wqkv.at[:, :, :D].multiply(scale)
    p["wqkv"] = wqkv.astype(params["wqkv"].dtype)

    bqkv = params["bqkv"].astype(jnp.float32)
    bqkv = bqkv.at[:, :, :D].multiply(scale)
    p["bqkv"] = bqkv.astype(params["bqkv"].dtype)

    p["wo"] = params["wo"].reshape(L, num_heads, hd, D)
    return p


# ---------------------------------------------------------------------------
# Kernel 1: the whole stack of CLIP ResidualAttentionBlocks.
# Grid = (B // B_tile, L): batch-block axis is parallel (megacore), l is the
# sequential layer axis.  The output block (B_tile, S, D) is indexed by b only
# -> it stays resident in VMEM across the layer loop; layer-l weights are
# indexed by l -> the pipeline prefetches layer l+1 weights during layer l.
# ---------------------------------------------------------------------------
def clip_layers_kernel(x_ref, ln1_g, ln1_b, wqkv, bqkv, wo, bo,
                       ln2_g, ln2_b, w1, b1, w2, b2,
                       y_ref, q_hs, k_hs, v_hs, mask_sc, *, num_heads):
    l = pl.program_id(1)

    # Layer 0 of each batch block: seed the resident activation block and build
    # the causal mask once (scratch persists across the L layer steps).
    @pl.when(l == 0)
    def _():
        y_ref[...] = x_ref[...]
        S = mask_sc.shape[0]
        row = jax.lax.broadcasted_iota(jnp.int32, (S, S), 0)
        col = jax.lax.broadcasted_iota(jnp.int32, (S, S), 1)
        mask_sc[...] = jnp.where(col <= row, 0.0, -1e9).astype(jnp.float32)

    x = y_ref[...].astype(jnp.float32)                    # (Bt, S, D) f32 residual
    Bt, S, D = x.shape
    H = num_heads
    hd = D // H

    # ---- multi-head causal self attention (pre-LN) ----
    h = _layernorm(x, ln1_g[0], ln1_b[0])                 # (Bt, S, D) f32
    h2 = h.reshape(Bt * S, D).astype(jnp.bfloat16)
    qkv = jnp.dot(h2, wqkv[0], preferred_element_type=jnp.float32) + bqkv[0]
    # 1/sqrt(hd) is already folded into the q columns of wqkv/bqkv host-side.
    qkv = qkv.astype(jnp.bfloat16).reshape(Bt, S, 3 * D)  # single bf16 cast

    # Head-major relayout into VMEM scratch (head axis must move from lanes to
    # a leading axis for the per-head score contraction).
    # TODO(synk): hd < 128 makes these stores lane-masked; a fully lane-dense
    # head split would need a different weight/score formulation.
    for hi in range(H):
        q_hs[hi] = qkv[:, :, hi * hd:(hi + 1) * hd]
        k_hs[hi] = qkv[:, :, D + hi * hd:D + (hi + 1) * hd]
        v_hs[hi] = qkv[:, :, 2 * D + hi * hd:2 * D + (hi + 1) * hd]

    q = q_hs[...].reshape(H * Bt, S, hd)                  # leading-dim merge: free
    k = k_hs[...].reshape(H * Bt, S, hd)
    v = v_hs[...].reshape(H * Bt, S, hd)

    # Batched attention: one score matmul + one PV matmul for all heads/batch.
    s = jnp.einsum('nqd,nkd->nqk', q, k,
                   preferred_element_type=jnp.float32)    # (H*Bt, S, S) f32
    s = s + mask_sc[...][None, :, :]
    s = s - jnp.max(s, axis=-1, keepdims=True)
    p = jnp.exp(s)
    p = p * pl.reciprocal(jnp.sum(p, axis=-1, keepdims=True), approx=True)
    o = jnp.einsum('nqk,nkd->nqd', p.astype(jnp.bfloat16), v,
                   preferred_element_type=jnp.float32)    # (H*Bt, S, hd) f32
    o_bf = o.astype(jnp.bfloat16).reshape(H, Bt, S, hd)

    # Output projection with the head concat folded in: sum_h o_h @ wo[h].
    acc = jnp.zeros((Bt * S, D), jnp.float32)
    for hi in range(H):
        acc = acc + jnp.dot(o_bf[hi].reshape(Bt * S, hd), wo[0, hi],
                            preferred_element_type=jnp.float32)
    x = x + (acc + bo[0]).reshape(Bt, S, D)

    # ---- MLP: Linear(D, 4D) -> QuickGELU -> Linear(4D, D) ----
    h = _layernorm(x, ln2_g[0], ln2_b[0])
    hflat = h.reshape(Bt * S, D).astype(jnp.bfloat16)
    h1 = jnp.dot(hflat, w1[0], preferred_element_type=jnp.float32) + b1[0]
    h1 = h1 * jax.nn.sigmoid(1.702 * h1)                  # QuickGELU (f32)
    h2m = jnp.dot(h1.astype(jnp.bfloat16), w2[0],
                  preferred_element_type=jnp.float32) + b2[0]
    x = x + h2m.reshape(Bt, S, D)

    y_ref[...] = x.astype(y_ref.dtype)


def clip_layers(x, params, *, num_heads, batch_block=None):
    B, S, D = x.shape
    L = params["wqkv"].shape[0]
    H = num_heads
    hd = D // H

    Bt = _pick_batch_block(B) if batch_block is None else batch_block
    assert B % Bt == 0, "batch block must divide (padded) batch"

    args = [params[k] for k in LAYER_PARAM_KEYS]

    def layer_spec(a):
        # One layer's slab per grid step; index depends only on l so the
        # default double-buffering prefetches layer l+1 weights during layer l.
        zeros = (0,) * (a.ndim - 1)
        return pl.BlockSpec((1,) + a.shape[1:], lambda b, l, zeros=zeros: (l,) + zeros)

    in_specs = [pl.BlockSpec((Bt, S, D), lambda b, l: (b, 0, 0))]
    in_specs += [layer_spec(a) for a in args]
    out_spec = pl.BlockSpec((Bt, S, D), lambda b, l: (b, 0, 0))

    grid_spec = pltpu.PrefetchScalarGridSpec(
        num_scalar_prefetch=0,
        grid=(B // Bt, L),                       # batch blocks parallel, l sequential
        in_specs=in_specs,
        out_specs=out_spec,
        scratch_shapes=[pltpu.VMEM((H, Bt, S, hd), jnp.bfloat16) for _ in range(3)]
                       + [pltpu.VMEM((S, S), jnp.float32)],   # q/k/v head-major + mask
    )
    return pl.pallas_call(
        functools.partial(clip_layers_kernel, num_heads=num_heads),
        out_shape=jax.ShapeDtypeStruct((B, S, D), x.dtype),
        grid_spec=grid_spec,
        compiler_params=pltpu.CompilerParams(
            dimension_semantics=("parallel", "arbitrary"),
            # 48 MiB: above the 32 MiB default scoped limit, safely below v7x's
            # 64 MiB physical VMEM.  Raise (e.g. 96 MiB) on v5e/v6e (128 MiB).
            vmem_limit_bytes=48 * 1024 * 1024,
        ),
    )(x, *args)


# ---------------------------------------------------------------------------
# Kernel 2: ln_final (on gathered EOT features) + text_projection matmul
# ---------------------------------------------------------------------------
def final_proj_kernel(feat_ref, lnf_g, lnf_b, proj_ref, out_ref):
    f = _layernorm(feat_ref[...].astype(jnp.float32), lnf_g[...], lnf_b[...])
    out_ref[...] = jnp.dot(f.astype(jnp.bfloat16), proj_ref[...],
                           preferred_element_type=jnp.float32).astype(out_ref.dtype)


def final_projection(feats, lnf_g, lnf_b, proj):
    B, _ = feats.shape
    E = proj.shape[1]
    return pl.pallas_call(
        final_proj_kernel,
        out_shape=jax.ShapeDtypeStruct((B, E), feats.dtype),
    )(feats, lnf_g, lnf_b, proj)


# ---------------------------------------------------------------------------
# Parameter construction (deterministic, synthetic).  Per-layer params are
# stacked on a leading L axis; big matmul weights are stored in bfloat16.
# ---------------------------------------------------------------------------
def init_params(key, *, vocab, seq, d_model, num_heads, num_layers, embed_dim):
    del num_heads  # layout does not depend on head count
    D, L = d_model, num_layers
    ks = jax.random.split(key, 8)
    sc = 0.02

    def rnd(k, shape, dtype=jnp.float32):
        return (sc * jax.random.normal(k, shape)).astype(dtype)

    return {
        "token_embedding": rnd(ks[0], (vocab, D)),
        "positional_embedding": rnd(ks[1], (seq, D)),
        "lnf_g": jnp.ones((1, D), jnp.float32),
        "lnf_b": jnp.zeros((1, D), jnp.float32),
        "text_projection": rnd(ks[2], (D, embed_dim), jnp.bfloat16),
        # stacked per-layer params
        "ln1_g": jnp.ones((L, 1, D), jnp.float32),
        "ln1_b": jnp.zeros((L, 1, D), jnp.float32),
        "wqkv": rnd(ks[3], (L, D, 3 * D), jnp.bfloat16),
        "bqkv": jnp.zeros((L, 1, 3 * D), jnp.float32),
        "wo": rnd(ks[4], (L, D, D), jnp.bfloat16),
        "bo": jnp.zeros((L, 1, D), jnp.float32),
        "ln2_g": jnp.ones((L, 1, D), jnp.float32),
        "ln2_b": jnp.zeros((L, 1, D), jnp.float32),
        "w1": rnd(ks[5], (L, D, 4 * D), jnp.bfloat16),
        "b1": jnp.zeros((L, 1, 4 * D), jnp.float32),
        "w2": rnd(ks[6], (L, 4 * D, D), jnp.bfloat16),
        "b2": jnp.zeros((L, 1, D), jnp.float32),
    }


# ---------------------------------------------------------------------------
# TextCLIP.forward == model.encode_text(text)
# ---------------------------------------------------------------------------
def encode_text(text, params, *, num_heads):
    B, S = text.shape
    kparams = prepare_params(params, num_heads=num_heads)

    # TODO(synk): token-embedding + EOT gathers are data-dependent gathers;
    # they stay in plain JAX (XLA) rather than a Pallas DMA-gather kernel.
    x = jnp.take(params["token_embedding"], text, axis=0)        # (B, S, D)
    x = x + params["positional_embedding"][None, :S, :]

    # Pad S: sublane-align activations; once S is non-trivial also lane-align
    # the (S, S) score tiles (real CLIP S=77 -> 128).  Padded positions sit
    # behind the in-kernel causal mask and are never gathered below.
    S_pad = _round_up(S, 8)
    if S_pad > 64:
        S_pad = _round_up(S_pad, 128)
    if S_pad != S:
        x = jnp.pad(x, ((0, 0), (0, S_pad - S), (0, 0)))

    x = clip_layers(x, kparams, num_heads=num_heads)             # (B, S_pad, D)

    # features at the EOT token (argmax of token ids; CLIP's EOT has the
    # largest BPE id), then ln_final + text projection
    eot = jnp.argmax(text, axis=-1)                              # (B,)
    feats = x[jnp.arange(B), eot]                                # (B, D)
    return final_projection(feats, params["lnf_g"], params["lnf_b"],
                            params["text_projection"])           # (B, embed_dim)


# ---------------------------------------------------------------------------
if __name__ == "__main__":
    VOCAB, B, S, D, HEADS, LAYERS, EMBED = 64, 2, 8, 32, 4, 2, 16

    key = jax.random.PRNGKey(0)
    k_param, k_text = jax.random.split(key)

    params = init_params(k_param, vocab=VOCAB, seq=S, d_model=D,
                         num_heads=HEADS, num_layers=LAYERS, embed_dim=EMBED)
    text = jax.random.randint(k_text, (B, S), 1, VOCAB, dtype=jnp.int32)

    out = encode_text(text, params, num_heads=HEADS)
    jax.block_until_ready(out)
    assert out.shape == (B, EMBED) and out.dtype == jnp.float32
    print("KERNEL_OK")
</pallas_src>

<mosaic_0001>
module attributes {stable_mosaic.version = 11 : i64} {
  func.func @clip_layers_kernel(%arg0: i32, %arg1: i32, %arg2: memref<1x8x32xf32, #tpu.memory_space<vmem>>, %arg3: memref<1x1x32xf32, #tpu.memory_space<vmem>>, %arg4: memref<1x1x32xf32, #tpu.memory_space<vmem>>, %arg5: memref<1x32x96xbf16, #tpu.memory_space<vmem>>, %arg6: memref<1x1x96xf32, #tpu.memory_space<vmem>>, %arg7: memref<1x4x8x32xbf16, #tpu.memory_space<vmem>>, %arg8: memref<1x1x32xf32, #tpu.memory_space<vmem>>, %arg9: memref<1x1x32xf32, #tpu.memory_space<vmem>>, %arg10: memref<1x1x32xf32, #tpu.memory_space<vmem>>, %arg11: memref<1x32x128xbf16, #tpu.memory_space<vmem>>, %arg12: memref<1x1x128xf32, #tpu.memory_space<vmem>>, %arg13: memref<1x128x32xbf16, #tpu.memory_space<vmem>>, %arg14: memref<1x1x32xf32, #tpu.memory_space<vmem>>, %arg15: memref<1x8x32xf32, #tpu.memory_space<vmem>>, %arg16: memref<4x1x8x8xbf16, #tpu.memory_space<vmem>>, %arg17: memref<4x1x8x8xbf16, #tpu.memory_space<vmem>>, %arg18: memref<4x1x8x8xbf16, #tpu.memory_space<vmem>>, %arg19: memref<8x8xf32, #tpu.memory_space<vmem>>) attributes {dimension_semantics = [#tpu.dimension_semantics<parallel>, #tpu.dimension_semantics<arbitrary>], iteration_bounds = array<i64: 2, 2>, scalar_prefetch = 0 : i64, scratch_operands = 4 : i64, tpu.core_type = #tpu.core_type<tc>, window_params = [{transform_indices = @transform_0, window_bounds = array<i64: 1, 8, 32>}, {transform_indices = @transform_1, window_bounds = array<i64: 1, 1, 32>}, {transform_indices = @transform_2, window_bounds = array<i64: 1, 1, 32>}, {transform_indices = @transform_3, window_bounds = array<i64: 1, 32, 96>}, {transform_indices = @transform_4, window_bounds = array<i64: 1, 1, 96>}, {transform_indices = @transform_5, window_bounds = array<i64: 1, 4, 8, 32>}, {transform_indices = @transform_6, window_bounds = array<i64: 1, 1, 32>}, {transform_indices = @transform_7, window_bounds = array<i64: 1, 1, 32>}, {transform_indices = @transform_8, window_bounds = array<i64: 1, 1, 32>}, {transform_indices = @transform_9, window_bounds = array<i64: 1, 32, 128>}, {transform_indices = @transform_10, window_bounds = array<i64: 1, 1, 128>}, {transform_indices = @transform_11, window_bounds = array<i64: 1, 128, 32>}, {transform_indices = @transform_12, window_bounds = array<i64: 1, 1, 32>}, {transform_indices = @transform_13, window_bounds = array<i64: 1, 8, 32>}]} {
    %c0_i32 = arith.constant 0 : i32
    %0 = arith.cmpi eq, %arg1, %c0_i32 : i32
    %1 = arith.extui %0 : i1 to i32
    %c0_i32_0 = arith.constant 0 : i32
    %2 = arith.cmpi ne, %1, %c0_i32_0 : i32
    scf.if %2 {
      %c0_137 = arith.constant 0 : index
      %c0_138 = arith.constant 0 : index
      %c0_139 = arith.constant 0 : index
      %207 = vector.load %arg2[%c0_137, %c0_138, %c0_139] : memref<1x8x32xf32, #tpu.memory_space<vmem>>, vector<1x8x32xf32>
      %c0_140 = arith.constant 0 : index
      %c0_141 = arith.constant 0 : index
      %c0_142 = arith.constant 0 : index
      %208 = vector.load %arg15[%c0_140, %c0_141, %c0_142] : memref<1x8x32xf32, #tpu.memory_space<vmem>>, vector<1x8x32xf32>
      tpu.vector_store %arg15[%c0_140, %c0_141, %c0_142], %207 {strides = array<i32>} : memref<1x8x32xf32, #tpu.memory_space<vmem>>, vector<1x8x32xf32>,
      %209 = tpu.iota {dimensions = array<i32: 0>} : vector<8x8xi32>
      %210 = tpu.iota {dimensions = array<i32: 1>} : vector<8x8xi32>
      %211 = arith.cmpi sle, %210, %209 : vector<8x8xi32>
      %cst_143 = arith.constant 0.000000e+00 : f32
      %cst_144 = arith.constant -1.000000e+09 : f32
      %212 = vector.broadcast %cst_143 : f32 to vector<8x8xf32>
      %213 = vector.broadcast %cst_144 : f32 to vector<8x8xf32>
      %214 = arith.select %211, %212, %213 : vector<8x8xi1>, vector<8x8xf32>
      %c0_145 = arith.constant 0 : index
      %c0_146 = arith.constant 0 : index
      %215 = vector.load %arg19[%c0_145, %c0_146] : memref<8x8xf32, #tpu.memory_space<vmem>>, vector<8x8xf32>
      tpu.vector_store %arg19[%c0_145, %c0_146], %214 {strides = array<i32>} : memref<8x8xf32, #tpu.memory_space<vmem>>, vector<8x8xf32>,
    } else {
    }
    %c0 = arith.constant 0 : index
    %c0_1 = arith.constant 0 : index
    %c0_2 = arith.constant 0 : index
    %3 = vector.load %arg15[%c0, %c0_1, %c0_2] : memref<1x8x32xf32, #tpu.memory_space<vmem>>, vector<1x8x32xf32>
    %c0_3 = arith.constant 0 : index
    %c0_4 = arith.constant 0 : index
    %c0_5 = arith.constant 0 : index
    %4 = vector.load %arg3[%c0_3, %c0_4, %c0_5] : memref<1x1x32xf32, #tpu.memory_space<vmem>>, vector<1x1x32xf32>
    %5 = vector.shape_cast %4 : vector<1x1x32xf32> to vector<1x32xf32>
    %c0_6 = arith.constant 0 : index
    %c0_7 = arith.constant 0 : index
    %c0_8 = arith.constant 0 : index
    %6 = vector.load %arg4[%c0_6, %c0_7, %c0_8] : memref<1x1x32xf32, #tpu.memory_space<vmem>>, vector<1x1x32xf32>
    %7 = vector.shape_cast %6 : vector<1x1x32xf32> to vector<1x32xf32>
    %cst = arith.constant dense<0.000000e+00> : vector<1x8xf32>
    %8 = vector.multi_reduction <add>, %3, %cst [2] : vector<1x8x32xf32> to vector<1x8xf32>
    %9 = vector.shape_cast %8 : vector<1x8xf32> to vector<1x8x1xf32>
    %cst_9 = arith.constant 3.200000e+01 : f32
    %10 = vector.broadcast %cst_9 : f32 to vector<1x8x1xf32>
    %11 = arith.divf %9, %10 : vector<1x8x1xf32>
    %12 = vector.broadcast %11 : vector<1x8x1xf32> to vector<1x8x32xf32>
    %13 = arith.subf %3, %12 : vector<1x8x32xf32>
    %14 = arith.mulf %13, %13 : vector<1x8x32xf32>
    %cst_10 = arith.constant dense<0.000000e+00> : vector<1x8xf32>
    %15 = vector.multi_reduction <add>, %14, %cst_10 [2] : vector<1x8x32xf32> to vector<1x8xf32>
    %16 = vector.shape_cast %15 : vector<1x8xf32> to vector<1x8x1xf32>
    %cst_11 = arith.constant 3.200000e+01 : f32
    %17 = vector.broadcast %cst_11 : f32 to vector<1x8x1xf32>
    %18 = arith.divf %16, %17 : vector<1x8x1xf32>
    %19 = vector.broadcast %11 : vector<1x8x1xf32> to vector<1x8x32xf32>
    %20 = arith.subf %3, %19 : vector<1x8x32xf32>
    %cst_12 = arith.constant 9.99999974E-6 : f32
    %21 = vector.broadcast %cst_12 : f32 to vector<1x8x1xf32>
    %22 = arith.addf %18, %21 : vector<1x8x1xf32>
    %23 = math.rsqrt %22 : vector<1x8x1xf32>
    %24 = vector.broadcast %23 : vector<1x8x1xf32> to vector<1x8x32xf32>
    %25 = arith.mulf %20, %24 : vector<1x8x32xf32>
    %26 = vector.shape_cast %5 : vector<1x32xf32> to vector<1x1x32xf32>
    %27 = vector.broadcast %26 : vector<1x1x32xf32> to vector<1x8x32xf32>
    %28 = arith.mulf %25, %27 : vector<1x8x32xf32>
    %29 = vector.shape_cast %7 : vector<1x32xf32> to vector<1x1x32xf32>
    %30 = vector.broadcast %29 : vector<1x1x32xf32> to vector<1x8x32xf32>
    %31 = arith.addf %28, %30 : vector<1x8x32xf32>
    %32 = vector.shape_cast %31 : vector<1x8x32xf32> to vector<8x32xf32>
    %33 = arith.truncf %32 : vector<8x32xf32> to vector<8x32xbf16>
    %c0_13 = arith.constant 0 : index
    %c0_14 = arith.constant 0 : index
    %c0_15 = arith.constant 0 : index
    %34 = vector.load %arg5[%c0_13, %c0_14, %c0_15] : memref<1x32x96xbf16, #tpu.memory_space<vmem>>, vector<1x32x96xbf16>
    %35 = vector.shape_cast %34 : vector<1x32x96xbf16> to vector<32x96xbf16>
    %cst_16 = arith.constant dense<0.000000e+00> : vector<8x96xf32>
    %36 = tpu.matmul %33, %35, %cst_16 {dimension_numbers = #tpu.dot_dimension_numbers<[1], [0], [0], [1], [0, 0, 1, 1], [], []>} : vector<8x32xbf16>, vector<32x96xbf16>, vector<8x96xf32> -> vector<8x96xf32>
    %c0_17 = arith.constant 0 : index
    %c0_18 = arith.constant 0 : index
    %c0_19 = arith.constant 0 : index
    %37 = vector.load %arg6[%c0_17, %c0_18, %c0_19] : memref<1x1x96xf32, #tpu.memory_space<vmem>>, vector<1x1x96xf32>
    %38 = vector.shape_cast %37 : vector<1x1x96xf32> to vector<1x96xf32>
    %39 = vector.broadcast %38 : vector<1x96xf32> to vector<8x96xf32>
    %40 = arith.addf %36, %39 : vector<8x96xf32>
    %41 = arith.truncf %40 : vector<8x96xf32> to vector<8x96xbf16>
    %42 = vector.shape_cast %41 : vector<8x96xbf16> to vector<1x8x96xbf16>
    %43 = vector.extract_strided_slice %42 {offsets = [0, 0, 0], sizes = [1, 8, 8], strides = [1, 1, 1]} : vector<1x8x96xbf16> to vector<1x8x8xbf16>
    %c0_20 = arith.constant 0 : index
    %c0_21 = arith.constant 0 : index
    %c0_22 = arith.constant 0 : index
    %c0_23 = arith.constant 0 : index
    %44 = vector.load %arg16[%c0_20, %c0_21, %c0_22, %c0_23] : memref<4x1x8x8xbf16, #tpu.memory_space<vmem>>, vector<1x1x8x8xbf16>
    %45 = vector.shape_cast %44 : vector<1x1x8x8xbf16> to vector<1x8x8xbf16>
    %46 = vector.shape_cast %43 : vector<1x8x8xbf16> to vector<1x1x8x8xbf16>
    tpu.vector_store %arg16[%c0_20, %c0_21, %c0_22, %c0_23], %46 {strides = array<i32>} : memref<4x1x8x8xbf16, #tpu.memory_space<vmem>>, vector<1x1x8x8xbf16>,
    %47 = vector.extract_strided_slice %42 {offsets = [0, 0, 32], sizes = [1, 8, 8], strides = [1, 1, 1]} : vector<1x8x96xbf16> to vector<1x8x8xbf16>
    %c0_24 = arith.constant 0 : index
    %c0_25 = arith.constant 0 : index
    %c0_26 = arith.constant 0 : index
    %c0_27 = arith.constant 0 : index
    %48 = vector.load %arg17[%c0_24, %c0_25, %c0_26, %c0_27] : memref<4x1x8x8xbf16, #tpu.memory_space<vmem>>, vector<1x1x8x8xbf16>
    %49 = vector.shape_cast %48 : vector<1x1x8x8xbf16> to vector<1x8x8xbf16>
    %50 = vector.shape_cast %47 : vector<1x8x8xbf16> to vector<1x1x8x8xbf16>
    tpu.vector_store %arg17[%c0_24, %c0_25, %c0_26, %c0_27], %50 {strides = array<i32>} : memref<4x1x8x8xbf16, #tpu.memory_space<vmem>>, vector<1x1x8x8xbf16>,
    %51 = vector.extract_strided_slice %42 {offsets = [0, 0, 64], sizes = [1, 8, 8], strides = [1, 1, 1]} : vector<1x8x96xbf16> to vector<1x8x8xbf16>
    %c0_28 = arith.constant 0 : index
    %c0_29 = arith.constant 0 : index
    %c0_30 = arith.constant 0 : index
    %c0_31 = arith.constant 0 : index
    %52 = vector.load %arg18[%c0_28, %c0_29, %c0_30, %c0_31] : memref<4x1x8x8xbf16, #tpu.memory_space<vmem>>, vector<1x1x8x8xbf16>
    %53 = vector.shape_cast %52 : vector<1x1x8x8xbf16> to vector<1x8x8xbf16>
    %54 = vector.shape_cast %51 : vector<1x8x8xbf16> to vector<1x1x8x8xbf16>
    tpu.vector_store %arg18[%c0_28, %c0_29, %c0_30, %c0_31], %54 {strides = array<i32>} : memref<4x1x8x8xbf16, #tpu.memory_space<vmem>>, vector<1x1x8x8xbf16>,
    %55 = vector.extract_strided_slice %42 {offsets = [0, 0, 8], sizes = [1, 8, 8], strides = [1, 1, 1]} : vector<1x8x96xbf16> to vector<1x8x8xbf16>
    %c1 = arith.constant 1 : index
    %c0_32 = arith.constant 0 : index
    %c0_33 = arith.constant 0 : index
    %c0_34 = arith.constant 0 : index
    %56 = vector.load %arg16[%c1, %c0_32, %c0_33, %c0_34] : memref<4x1x8x8xbf16, #tpu.memory_space<vmem>>, vector<1x1x8x8xbf16>
    %57 = vector.shape_cast %56 : vector<1x1x8x8xbf16> to vector<1x8x8xbf16>
    %58 = vector.shape_cast %55 : vector<1x8x8xbf16> to vector<1x1x8x8xbf16>
    tpu.vector_store %arg16[%c1, %c0_32, %c0_33, %c0_34], %58 {strides = array<i32>} : memref<4x1x8x8xbf16, #tpu.memory_space<vmem>>, vector<1x1x8x8xbf16>,
    %59 = vector.extract_strided_slice %42 {offsets = [0, 0, 40], sizes = [1, 8, 8], strides = [1, 1, 1]} : vector<1x8x96xbf16> to vector<1x8x8xbf16>
    %c1_35 = arith.constant 1 : index
    %c0_36 = arith.constant 0 : index
    %c0_37 = arith.constant 0 : index
    %c0_38 = arith.constant 0 : index
    %60 = vector.load %arg17[%c1_35, %c0_36, %c0_37, %c0_38] : memref<4x1x8x8xbf16, #tpu.memory_space<vmem>>, vector<1x1x8x8xbf16>
    %61 = vector.shape_cast %60 : vector<1x1x8x8xbf16> to vector<1x8x8xbf16>
    %62 = vector.shape_cast %59 : vector<1x8x8xbf16> to vector<1x1x8x8xbf16>
    tpu.vector_store %arg17[%c1_35, %c0_36, %c0_37, %c0_38], %62 {strides = array<i32>} : memref<4x1x8x8xbf16, #tpu.memory_space<vmem>>, vector<1x1x8x8xbf16>,
    %63 = vector.extract_strided_slice %42 {offsets = [0, 0, 72], sizes = [1, 8, 8], strides = [1, 1, 1]} : vector<1x8x96xbf16> to vector<1x8x8xbf16>
    %c1_39 = arith.constant 1 : index
    %c0_40 = arith.constant 0 : index
    %c0_41 = arith.constant 0 : index
    %c0_42 = arith.constant 0 : index
    %64 = vector.load %arg18[%c1_39, %c0_40, %c0_41, %c0_42] : memref<4x1x8x8xbf16, #tpu.memory_space<vmem>>, vector<1x1x8x8xbf16>
    %65 = vector.shape_cast %64 : vector<1x1x8x8xbf16> to vector<1x8x8xbf16>
    %66 = vector.shape_cast %63 : vector<1x8x8xbf16> to vector<1x1x8x8xbf16>
    tpu.vector_store %arg18[%c1_39, %c0_40, %c0_41, %c0_42], %66 {strides = array<i32>} : memref<4x1x8x8xbf16, #tpu.memory_space<vmem>>, vector<1x1x8x8xbf16>,
    %67 = vector.extract_strided_slice %42 {offsets = [0, 0, 16], sizes = [1, 8, 8], strides = [1, 1, 1]} : vector<1x8x96xbf16> to vector<1x8x8xbf16>
    %c2 = arith.constant 2 : index
    %c0_43 = arith.constant 0 : index
    %c0_44 = arith.constant 0 : index
    %c0_45 = arith.constant 0 : index
    %68 = vector.load %arg16[%c2, %c0_43, %c0_44, %c0_45] : memref<4x1x8x8xbf16, #tpu.memory_space<vmem>>, vector<1x1x8x8xbf16>
    %69 = vector.shape_cast %68 : vector<1x1x8x8xbf16> to vector<1x8x8xbf16>
    %70 = vector.shape_cast %67 : vector<1x8x8xbf16> to vector<1x1x8x8xbf16>
    tpu.vector_store %arg16[%c2, %c0_43, %c0_44, %c0_45], %70 {strides = array<i32>} : memref<4x1x8x8xbf16, #tpu.memory_space<vmem>>, vector<1x1x8x8xbf16>,
    %71 = vector.extract_strided_slice %42 {offsets = [0, 0, 48], sizes = [1, 8, 8], strides = [1, 1, 1]} : vector<1x8x96xbf16> to vector<1x8x8xbf16>
    %c2_46 = arith.constant 2 : index
    %c0_47 = arith.constant 0 : index
    %c0_48 = arith.constant 0 : index
    %c0_49 = arith.constant 0 : index
    %72 = vector.load %arg17[%c2_46, %c0_47, %c0_48, %c0_49] : memref<4x1x8x8xbf16, #tpu.memory_space<vmem>>, vector<1x1x8x8xbf16>
    %73 = vector.shape_cast %72 : vector<1x1x8x8xbf16> to vector<1x8x8xbf16>
    %74 = vector.shape_cast %71 : vector<1x8x8xbf16> to vector<1x1x8x8xbf16>
    tpu.vector_store %arg17[%c2_46, %c0_47, %c0_48, %c0_49], %74 {strides = array<i32>} : memref<4x1x8x8xbf16, #tpu.memory_space<vmem>>, vector<1x1x8x8xbf16>,
    %75 = vector.extract_strided_slice %42 {offsets = [0, 0, 80], sizes = [1, 8, 8], strides = [1, 1, 1]} : vector<1x8x96xbf16> to vector<1x8x8xbf16>
    %c2_50 = arith.constant 2 : index
    %c0_51 = arith.constant 0 : index
    %c0_52 = arith.constant 0 : index
    %c0_53 = arith.constant 0 : index
    %76 = vector.load %arg18[%c2_50, %c0_51, %c0_52, %c0_53] : memref<4x1x8x8xbf16, #tpu.memory_space<vmem>>, vector<1x1x8x8xbf16>
    %77 = vector.shape_cast %76 : vector<1x1x8x8xbf16> to vector<1x8x8xbf16>
    %78 = vector.shape_cast %75 : vector<1x8x8xbf16> to vector<1x1x8x8xbf16>
    tpu.vector_store %arg18[%c2_50, %c0_51, %c0_52, %c0_53], %78 {strides = array<i32>} : memref<4x1x8x8xbf16, #tpu.memory_space<vmem>>, vector<1x1x8x8xbf16>,
    %79 = vector.extract_strided_slice %42 {offsets = [0, 0, 24], sizes = [1, 8, 8], strides = [1, 1, 1]} : vector<1x8x96xbf16> to vector<1x8x8xbf16>
    %c3 = arith.constant 3 : index
    %c0_54 = arith.constant 0 : index
    %c0_55 = arith.constant 0 : index
    %c0_56 = arith.constant 0 : index
    %80 = vector.load %arg16[%c3, %c0_54, %c0_55, %c0_56] : memref<4x1x8x8xbf16, #tpu.memory_space<vmem>>, vector<1x1x8x8xbf16>
    %81 = vector.shape_cast %80 : vector<1x1x8x8xbf16> to vector<1x8x8xbf16>
    %82 = vector.shape_cast %79 : vector<1x8x8xbf16> to vector<1x1x8x8xbf16>
    tpu.vector_store %arg16[%c3, %c0_54, %c0_55, %c0_56], %82 {strides = array<i32>} : memref<4x1x8x8xbf16, #tpu.memory_space<vmem>>, vector<1x1x8x8xbf16>,
    %83 = vector.extract_strided_slice %42 {offsets = [0, 0, 56], sizes = [1, 8, 8], strides = [1, 1, 1]} : vector<1x8x96xbf16> to vector<1x8x8xbf16>
    %c3_57 = arith.constant 3 : index
    %c0_58 = arith.constant 0 : index
    %c0_59 = arith.constant 0 : index
    %c0_60 = arith.constant 0 : index
    %84 = vector.load %arg17[%c3_57, %c0_58, %c0_59, %c0_60] : memref<4x1x8x8xbf16, #tpu.memory_space<vmem>>, vector<1x1x8x8xbf16>
    %85 = vector.shape_cast %84 : vector<1x1x8x8xbf16> to vector<1x8x8xbf16>
    %86 = vector.shape_cast %83 : vector<1x8x8xbf16> to vector<1x1x8x8xbf16>
    tpu.vector_store %arg17[%c3_57, %c0_58, %c0_59, %c0_60], %86 {strides = array<i32>} : memref<4x1x8x8xbf16, #tpu.memory_space<vmem>>, vector<1x1x8x8xbf16>,
    %87 = vector.extract_strided_slice %42 {offsets = [0, 0, 88], sizes = [1, 8, 8], strides = [1, 1, 1]} : vector<1x8x96xbf16> to vector<1x8x8xbf16>
    %c3_61 = arith.constant 3 : index
    %c0_62 = arith.constant 0 : index
    %c0_63 = arith.constant 0 : index
    %c0_64 = arith.constant 0 : index
    %88 = vector.load %arg18[%c3_61, %c0_62, %c0_63, %c0_64] : memref<4x1x8x8xbf16, #tpu.memory_space<vmem>>, vector<1x1x8x8xbf16>
    %89 = vector.shape_cast %88 : vector<1x1x8x8xbf16> to vector<1x8x8xbf16>
    %90 = vector.shape_cast %87 : vector<1x8x8xbf16> to vector<1x1x8x8xbf16>
    tpu.vector_store %arg18[%c3_61, %c0_62, %c0_63, %c0_64], %90 {strides = array<i32>} : memref<4x1x8x8xbf16, #tpu.memory_space<vmem>>, vector<1x1x8x8xbf16>,
    %c0_65 = arith.constant 0 : index
    %c0_66 = arith.constant 0 : index
    %c0_67 = arith.constant 0 : index
    %c0_68 = arith.constant 0 : index
    %91 = vector.load %arg16[%c0_65, %c0_66, %c0_67, %c0_68] : memref<4x1x8x8xbf16, #tpu.memory_space<vmem>>, vector<4x1x8x8xbf16>
    %92 = vector.shape_cast %91 : vector<4x1x8x8xbf16> to vector<4x8x8xbf16>
    %c0_69 = arith.constant 0 : index
    %c0_70 = arith.constant 0 : index
    %c0_71 = arith.constant 0 : index
    %c0_72 = arith.constant 0 : index
    %93 = vector.load %arg17[%c0_69, %c0_70, %c0_71, %c0_72] : memref<4x1x8x8xbf16, #tpu.memory_space<vmem>>, vector<4x1x8x8xbf16>
    %94 = vector.shape_cast %93 : vector<4x1x8x8xbf16> to vector<4x8x8xbf16>
    %c0_73 = arith.constant 0 : index
    %c0_74 = arith.constant 0 : index
    %c0_75 = arith.constant 0 : index
    %c0_76 = arith.constant 0 : index
    %95 = vector.load %arg18[%c0_73, %c0_74, %c0_75, %c0_76] : memref<4x1x8x8xbf16, #tpu.memory_space<vmem>>, vector<4x1x8x8xbf16>
    %96 = vector.shape_cast %95 : vector<4x1x8x8xbf16> to vector<4x8x8xbf16>
    "tpu.trace_start"() <{level = 10 : i32, message = "nqd,nkd->nqk"}> : () -> ()
    %cst_77 = arith.constant dense<0.000000e+00> : vector<4x8x8xf32>
    %97 = tpu.matmul %92, %94, %cst_77 {dimension_numbers = #tpu.dot_dimension_numbers<[2], [2], [1], [1], [0, 0, 0, 1, 1, 1], [0], [0]>} : vector<4x8x8xbf16>, vector<4x8x8xbf16>, vector<4x8x8xf32> -> vector<4x8x8xf32>
    "tpu.trace_stop"() : () -> ()
    %c0_78 = arith.constant 0 : index
    %c0_79 = arith.constant 0 : index
    %98 = vector.load %arg19[%c0_78, %c0_79] : memref<8x8xf32, #tpu.memory_space<vmem>>, vector<8x8xf32>
    %99 = vector.shape_cast %98 : vector<8x8xf32> to vector<1x8x8xf32>
    %100 = vector.broadcast %99 : vector<1x8x8xf32> to vector<4x8x8xf32>
    %101 = arith.addf %97, %100 : vector<4x8x8xf32>
    %cst_80 = arith.constant dense<0xFF800000> : vector<4x8xf32>
    %102 = vector.multi_reduction <maximumf>, %101, %cst_80 [2] : vector<4x8x8xf32> to vector<4x8xf32>
    %103 = vector.shape_cast %102 : vector<4x8xf32> to vector<4x8x1xf32>
    %104 = vector.broadcast %103 : vector<4x8x1xf32> to vector<4x8x8xf32>
    %105 = arith.subf %101, %104 : vector<4x8x8xf32>
    %106 = math.exp %105 : vector<4x8x8xf32>
    %cst_81 = arith.constant dense<0.000000e+00> : vector<4x8xf32>
    %107 = vector.multi_reduction <add>, %106, %cst_81 [2] : vector<4x8x8xf32> to vector<4x8xf32>
    %108 = vector.shape_cast %107 : vector<4x8xf32> to vector<4x8x1xf32>
    %109 = tpu.reciprocal %108 {approx = true} : vector<4x8x1xf32> -> vector<4x8x1xf32>
    %110 = vector.broadcast %109 : vector<4x8x1xf32> to vector<4x8x8xf32>
    %111 = arith.mulf %106, %110 : vector<4x8x8xf32>
    %112 = arith.truncf %111 : vector<4x8x8xf32> to vector<4x8x8xbf16>
    "tpu.trace_start"() <{level = 10 : i32, message = "nqk,nkd->nqd"}> : () -> ()
    %cst_82 = arith.constant dense<0.000000e+00> : vector<4x8x8xf32>
    %113 = tpu.matmul %112, %96, %cst_82 {dimension_numbers = #tpu.dot_dimension_numbers<[2], [1], [1], [2], [0, 0, 0, 1, 1, 2], [0], [0]>} : vector<4x8x8xbf16>, vector<4x8x8xbf16>, vector<4x8x8xf32> -> vector<4x8x8xf32>
    "tpu.trace_stop"() : () -> ()
    %114 = arith.truncf %113 : vector<4x8x8xf32> to vector<4x8x8xbf16>
    %115 = vector.shape_cast %114 : vector<4x8x8xbf16> to vector<4x1x8x8xbf16>
    %cst_83 = arith.constant 0.000000e+00 : f32
    %116 = vector.broadcast %cst_83 : f32 to vector<8x32xf32>
    %117 = vector.extract_strided_slice %115 {offsets = [0, 0, 0, 0], sizes = [1, 1, 8, 8], strides = [1, 1, 1, 1]} : vector<4x1x8x8xbf16> to vector<1x1x8x8xbf16>
    %118 = vector.shape_cast %117 : vector<1x1x8x8xbf16> to vector<1x8x8xbf16>
    %119 = vector.shape_cast %118 : vector<1x8x8xbf16> to vector<8x8xbf16>
    %c0_84 = arith.constant 0 : index
    %c0_85 = arith.constant 0 : index
    %c0_86 = arith.constant 0 : index
    %c0_87 = arith.constant 0 : index
    %120 = vector.load %arg7[%c0_84, %c0_85, %c0_86, %c0_87] : memref<1x4x8x32xbf16, #tpu.memory_space<vmem>>, vector<1x1x8x32xbf16>
    %121 = vector.shape_cast %120 : vector<1x1x8x32xbf16> to vector<8x32xbf16>
    %cst_88 = arith.constant dense<0.000000e+00> : vector<8x32xf32>
    %122 = tpu.matmul %119, %121, %cst_88 {dimension_numbers = #tpu.dot_dimension_numbers<[1], [0], [0], [1], [0, 0, 1, 1], [], []>} : vector<8x8xbf16>, vector<8x32xbf16>, vector<8x32xf32> -> vector<8x32xf32>
    %123 = arith.addf %116, %122 : vector<8x32xf32>
    %124 = vector.extract_strided_slice %115 {offsets = [1, 0, 0, 0], sizes = [1, 1, 8, 8], strides = [1, 1, 1, 1]} : vector<4x1x8x8xbf16> to vector<1x1x8x8xbf16>
    %125 = vector.shape_cast %124 : vector<1x1x8x8xbf16> to vector<1x8x8xbf16>
    %126 = vector.shape_cast %125 : vector<1x8x8xbf16> to vector<8x8xbf16>
    %c0_89 = arith.constant 0 : index
    %c1_90 = arith.constant 1 : index
    %c0_91 = arith.constant 0 : index
    %c0_92 = arith.constant 0 : index
    %127 = vector.load %arg7[%c0_89, %c1_90, %c0_91, %c0_92] : memref<1x4x8x32xbf16, #tpu.memory_space<vmem>>, vector<1x1x8x32xbf16>
    %128 = vector.shape_cast %127 : vector<1x1x8x32xbf16> to vector<8x32xbf16>
    %cst_93 = arith.constant dense<0.000000e+00> : vector<8x32xf32>
    %129 = tpu.matmul %126, %128, %cst_93 {dimension_numbers = #tpu.dot_dimension_numbers<[1], [0], [0], [1], [0, 0, 1, 1], [], []>} : vector<8x8xbf16>, vector<8x32xbf16>, vector<8x32xf32> -> vector<8x32xf32>
    %130 = arith.addf %123, %129 : vector<8x32xf32>
    %131 = vector.extract_strided_slice %115 {offsets = [2, 0, 0, 0], sizes = [1, 1, 8, 8], strides = [1, 1, 1, 1]} : vector<4x1x8x8xbf16> to vector<1x1x8x8xbf16>
    %132 = vector.shape_cast %131 : vector<1x1x8x8xbf16> to vector<1x8x8xbf16>
    %133 = vector.shape_cast %132 : vector<1x8x8xbf16> to vector<8x8xbf16>
    %c0_94 = arith.constant 0 : index
    %c2_95 = arith.constant 2 : index
    %c0_96 = arith.constant 0 : index
    %c0_97 = arith.constant 0 : index
    %134 = vector.load %arg7[%c0_94, %c2_95, %c0_96, %c0_97] : memref<1x4x8x32xbf16, #tpu.memory_space<vmem>>, vector<1x1x8x32xbf16>
    %135 = vector.shape_cast %134 : vector<1x1x8x32xbf16> to vector<8x32xbf16>
    %cst_98 = arith.constant dense<0.000000e+00> : vector<8x32xf32>
    %136 = tpu.matmul %133, %135, %cst_98 {dimension_numbers = #tpu.dot_dimension_numbers<[1], [0], [0], [1], [0, 0, 1, 1], [], []>} : vector<8x8xbf16>, vector<8x32xbf16>, vector<8x32xf32> -> vector<8x32xf32>
    %137 = arith.addf %130, %136 : vector<8x32xf32>
    %138 = vector.extract_strided_slice %115 {offsets = [3, 0, 0, 0], sizes = [1, 1, 8, 8], strides = [1, 1, 1, 1]} : vector<4x1x8x8xbf16> to vector<1x1x8x8xbf16>
    %139 = vector.shape_cast %138 : vector<1x1x8x8xbf16> to vector<1x8x8xbf16>
    %140 = vector.shape_cast %139 : vector<1x8x8xbf16> to vector<8x8xbf16>
    %c0_99 = arith.constant 0 : index
    %c3_100 = arith.constant 3 : index
    %c0_101 = arith.constant 0 : index
    %c0_102 = arith.constant 0 : index
    %141 = vector.load %arg7[%c0_99, %c3_100, %c0_101, %c0_102] : memref<1x4x8x32xbf16, #tpu.memory_space<vmem>>, vector<1x1x8x32xbf16>
    %142 = vector.shape_cast %141 : vector<1x1x8x32xbf16> to vector<8x32xbf16>
    %cst_103 = arith.constant dense<0.000000e+00> : vector<8x32xf32>
    %143 = tpu.matmul %140, %142, %cst_103 {dimension_numbers = #tpu.dot_dimension_numbers<[1], [0], [0], [1], [0, 0, 1, 1], [], []>} : vector<8x8xbf16>, vector<8x32xbf16>, vector<8x32xf32> -> vector<8x32xf32>
    %144 = arith.addf %137, %143 : vector<8x32xf32>
    %c0_104 = arith.constant 0 : index
    %c0_105 = arith.constant 0 : index
    %c0_106 = arith.constant 0 : index
    %145 = vector.load %arg8[%c0_104, %c0_105, %c0_106] : memref<1x1x32xf32, #tpu.memory_space<vmem>>, vector<1x1x32xf32>
    %146 = vector.shape_cast %145 : vector<1x1x32xf32> to vector<1x32xf32>
    %147 = vector.broadcast %146 : vector<1x32xf32> to vector<8x32xf32>
    %148 = arith.addf %144, %147 : vector<8x32xf32>
    %149 = vector.shape_cast %148 : vector<8x32xf32> to vector<1x8x32xf32>
    %150 = arith.addf %3, %149 : vector<1x8x32xf32>
    %c0_107 = arith.constant 0 : index
    %c0_108 = arith.constant 0 : index
    %c0_109 = arith.constant 0 : index
    %151 = vector.load %arg9[%c0_107, %c0_108, %c0_109] : memref<1x1x32xf32, #tpu.memory_space<vmem>>, vector<1x1x32xf32>
    %152 = vector.shape_cast %151 : vector<1x1x32xf32> to vector<1x32xf32>
    %c0_110 = arith.constant 0 : index
    %c0_111 = arith.constant 0 : index
    %c0_112 = arith.constant 0 : index
    %153 = vector.load %arg10[%c0_110, %c0_111, %c0_112] : memref<1x1x32xf32, #tpu.memory_space<vmem>>, vector<1x1x32xf32>
    %154 = vector.shape_cast %153 : vector<1x1x32xf32> to vector<1x32xf32>
    %cst_113 = arith.constant dense<0.000000e+00> : vector<1x8xf32>
    %155 = vector.multi_reduction <add>, %150, %cst_113 [2] : vector<1x8x32xf32> to vector<1x8xf32>
    %156 = vector.shape_cast %155 : vector<1x8xf32> to vector<1x8x1xf32>
    %cst_114 = arith.constant 3.200000e+01 : f32
    %157 = vector.broadcast %cst_114 : f32 to vector<1x8x1xf32>
    %158 = arith.divf %156, %157 : vector<1x8x1xf32>
    %159 = vector.broadcast %158 : vector<1x8x1xf32> to vector<1x8x32xf32>
    %160 = arith.subf %150, %159 : vector<1x8x32xf32>
    %161 = arith.mulf %160, %160 : vector<1x8x32xf32>
    %cst_115 = arith.constant dense<0.000000e+00> : vector<1x8xf32>
    %162 = vector.multi_reduction <add>, %161, %cst_115 [2] : vector<1x8x32xf32> to vector<1x8xf32>
    %163 = vector.shape_cast %162 : vector<1x8xf32> to vector<1x8x1xf32>
    %cst_116 = arith.constant 3.200000e+01 : f32
    %164 = vector.broadcast %cst_116 : f32 to vector<1x8x1xf32>
    %165 = arith.divf %163, %164 : vector<1x8x1xf32>
    %166 = vector.broadcast %158 : vector<1x8x1xf32> to vector<1x8x32xf32>
    %167 = arith.subf %150, %166 : vector<1x8x32xf32>
    %cst_117 = arith.constant 9.99999974E-6 : f32
    %168 = vector.broadcast %cst_117 : f32 to vector<1x8x1xf32>
    %169 = arith.addf %165, %168 : vector<1x8x1xf32>
    %170 = math.rsqrt %169 : vector<1x8x1xf32>
    %171 = vector.broadcast %170 : vector<1x8x1xf32> to vector<1x8x32xf32>
    %172 = arith.mulf %167, %171 : vector<1x8x32xf32>
    %173 = vector.shape_cast %152 : vector<1x32xf32> to vector<1x1x32xf32>
    %174 = vector.broadcast %173 : vector<1x1x32xf32> to vector<1x8x32xf32>
    %175 = arith.mulf %172, %174 : vector<1x8x32xf32>
    %176 = vector.shape_cast %154 : vector<1x32xf32> to vector<1x1x32xf32>
    %177 = vector.broadcast %176 : vector<1x1x32xf32> to vector<1x8x32xf32>
    %178 = arith.addf %175, %177 : vector<1x8x32xf32>
    %179 = vector.shape_cast %178 : vector<1x8x32xf32> to vector<8x32xf32>
    %180 = arith.truncf %179 : vector<8x32xf32> to vector<8x32xbf16>
    %c0_118 = arith.constant 0 : index
    %c0_119 = arith.constant 0 : index
    %c0_120 = arith.constant 0 : index
    %181 = vector.load %arg11[%c0_118, %c0_119, %c0_120] : memref<1x32x128xbf16, #tpu.memory_space<vmem>>, vector<1x32x128xbf16>
    %182 = vector.shape_cast %181 : vector<1x32x128xbf16> to vector<32x128xbf16>
    %cst_121 = arith.constant dense<0.000000e+00> : vector<8x128xf32>
    %183 = tpu.matmul %180, %182, %cst_121 {dimension_numbers = #tpu.dot_dimension_numbers<[1], [0], [0], [1], [0, 0, 1, 1], [], []>} : vector<8x32xbf16>, vector<32x128xbf16>, vector<8x128xf32> -> vector<8x128xf32>
    %c0_122 = arith.constant 0 : index
    %c0_123 = arith.constant 0 : index
    %c0_124 = arith.constant 0 : index
    %184 = vector.load %arg12[%c0_122, %c0_123, %c0_124] : memref<1x1x128xf32, #tpu.memory_space<vmem>>, vector<1x1x128xf32>
    %185 = vector.shape_cast %184 : vector<1x1x128xf32> to vector<1x128xf32>
    %186 = vector.broadcast %185 : vector<1x128xf32> to vector<8x128xf32>
    %187 = arith.addf %183, %186 : vector<8x128xf32>
    %cst_125 = arith.constant 1.702000e+00 : f32
    %188 = vector.broadcast %cst_125 : f32 to vector<8x128xf32>
    %189 = arith.mulf %188, %187 : vector<8x128xf32>
    %190 = arith.negf %189 : vector<8x128xf32>
    %191 = math.exp %190 : vector<8x128xf32>
    %cst_126 = arith.constant 1.000000e+00 : f32
    %192 = vector.broadcast %cst_126 : f32 to vector<8x128xf32>
    %193 = arith.addf %192, %191 : vector<8x128xf32>
    %194 = arith.divf %192, %193 : vector<8x128xf32>
    %195 = arith.mulf %187, %194 : vector<8x128xf32>
    %196 = arith.truncf %195 : vector<8x128xf32> to vector<8x128xbf16>
    %c0_127 = arith.constant 0 : index
    %c0_128 = arith.constant 0 : index
    %c0_129 = arith.constant 0 : index
    %197 = vector.load %arg13[%c0_127, %c0_128, %c0_129] : memref<1x128x32xbf16, #tpu.memory_space<vmem>>, vector<1x128x32xbf16>
    %198 = vector.shape_cast %197 : vector<1x128x32xbf16> to vector<128x32xbf16>
    %cst_130 = arith.constant dense<0.000000e+00> : vector<8x32xf32>
    %199 = tpu.matmul %196, %198, %cst_130 {dimension_numbers = #tpu.dot_dimension_numbers<[1], [0], [0], [1], [0, 0, 1, 1], [], []>} : vector<8x128xbf16>, vector<128x32xbf16>, vector<8x32xf32> -> vector<8x32xf32>
    %c0_131 = arith.constant 0 : index
    %c0_132 = arith.constant 0 : index
    %c0_133 = arith.constant 0 : index
    %200 = vector.load %arg14[%c0_131, %c0_132, %c0_133] : memref<1x1x32xf32, #tpu.memory_space<vmem>>, vector<1x1x32xf32>
    %201 = vector.shape_cast %200 : vector<1x1x32xf32> to vector<1x32xf32>
    %202 = vector.broadcast %201 : vector<1x32xf32> to vector<8x32xf32>
    %203 = arith.addf %199, %202 : vector<8x32xf32>
    %204 = vector.shape_cast %203 : vector<8x32xf32> to vector<1x8x32xf32>
    %205 = arith.addf %150, %204 : vector<1x8x32xf32>
    %c0_134 = arith.constant 0 : index
    %c0_135 = arith.constant 0 : index
    %c0_136 = arith.constant 0 : index
    %206 = vector.load %arg15[%c0_134, %c0_135, %c0_136] : memref<1x8x32xf32, #tpu.memory_space<vmem>>, vector<1x8x32xf32>
    tpu.vector_store %arg15[%c0_134, %c0_135, %c0_136], %205 {strides = array<i32>} : memref<1x8x32xf32, #tpu.memory_space<vmem>>, vector<1x8x32xf32>,
    return
  }
  func.func @transform_0(%arg0: i32, %arg1: i32) -> (i32, i32, i32) {
    %c0_i32 = arith.constant 0 : i32
    %c0_i32_0 = arith.constant 0 : i32
    %c0_i32_1 = arith.constant 0 : i32
    return %arg0, %c0_i32, %c0_i32_0 : i32, i32, i32
  }
  func.func @transform_1(%arg0: i32, %arg1: i32) -> (i32, i32, i32) {
    %c0_i32 = arith.constant 0 : i32
    %c0_i32_0 = arith.constant 0 : i32
    %c0_i32_1 = arith.constant 0 : i32
    return %arg1, %c0_i32, %c0_i32_0 : i32, i32, i32
  }
  func.func @transform_2(%arg0: i32, %arg1: i32) -> (i32, i32, i32) {
    %c0_i32 = arith.constant 0 : i32
    %c0_i32_0 = arith.constant 0 : i32
    %c0_i32_1 = arith.constant 0 : i32
    return %arg1, %c0_i32, %c0_i32_0 : i32, i32, i32
  }
  func.func @transform_3(%arg0: i32, %arg1: i32) -> (i32, i32, i32) {
    %c0_i32 = arith.constant 0 : i32
    %c0_i32_0 = arith.constant 0 : i32
    %c0_i32_1 = arith.constant 0 : i32
    return %arg1, %c0_i32, %c0_i32_0 : i32, i32, i32
  }
  func.func @transform_4(%arg0: i32, %arg1: i32) -> (i32, i32, i32) {
    %c0_i32 = arith.constant 0 : i32
    %c0_i32_0 = arith.constant 0 : i32
    %c0_i32_1 = arith.constant 0 : i32
    return %arg1, %c0_i32, %c0_i32_0 : i32, i32, i32
  }
  func.func @transform_5(%arg0: i32, %arg1: i32) -> (i32, i32, i32, i32) {
    %c0_i32 = arith.constant 0 : i32
    %c0_i32_0 = arith.constant 0 : i32
    %c0_i32_1 = arith.constant 0 : i32
    %c0_i32_2 = arith.constant 0 : i32
    return %arg1, %c0_i32, %c0_i32_0, %c0_i32_1 : i32, i32, i32, i32
  }
  func.func @transform_6(%arg0: i32, %arg1: i32) -> (i32, i32, i32) {
    %c0_i32 = arith.constant 0 : i32
    %c0_i32_0 = arith.constant 0 : i32
    %c0_i32_1 = arith.constant 0 : i32
    return %arg1, %c0_i32, %c0_i32_0 : i32, i32, i32
  }
  func.func @transform_7(%arg0: i32, %arg1: i32) -> (i32, i32, i32) {
    %c0_i32 = arith.constant 0 : i32
    %c0_i32_0 = arith.constant 0 : i32
    %c0_i32_1 = arith.constant 0 : i32
    return %arg1, %c0_i32, %c0_i32_0 : i32, i32, i32
  }
  func.func @transform_8(%arg0: i32, %arg1: i32) -> (i32, i32, i32) {
    %c0_i32 = arith.constant 0 : i32
    %c0_i32_0 = arith.constant 0 : i32
    %c0_i32_1 = arith.constant 0 : i32
    return %arg1, %c0_i32, %c0_i32_0 : i32, i32, i32
  }
  func.func @transform_9(%arg0: i32, %arg1: i32) -> (i32, i32, i32) {
    %c0_i32 = arith.constant 0 : i32
    %c0_i32_0 = arith.constant 0 : i32
    %c0_i32_1 = arith.constant 0 : i32
    return %arg1, %c0_i32, %c0_i32_0 : i32, i32, i32
  }
  func.func @transform_10(%arg0: i32, %arg1: i32) -> (i32, i32, i32) {
    %c0_i32 = arith.constant 0 : i32
    %c0_i32_0 = arith.constant 0 : i32
    %c0_i32_1 = arith.constant 0 : i32
    return %arg1, %c0_i32, %c0_i32_0 : i32, i32, i32
  }
  func.func @transform_11(%arg0: i32, %arg1: i32) -> (i32, i32, i32) {
    %c0_i32 = arith.constant 0 : i32
    %c0_i32_0 = arith.constant 0 : i32
    %c0_i32_1 = arith.constant 0 : i32
    return %arg1, %c0_i32, %c0_i32_0 : i32, i32, i32
  }
  func.func @transform_12(%arg0: i32, %arg1: i32) -> (i32, i32, i32) {
    %c0_i32 = arith.constant 0 : i32
    %c0_i32_0 = arith.constant 0 : i32
    %c0_i32_1 = arith.constant 0 : i32
    return %arg1, %c0_i32, %c0_i32_0 : i32, i32, i32
  }
  func.func @transform_13(%arg0: i32, %arg1: i32) -> (i32, i32, i32) {
    %c0_i32 = arith.constant 0 : i32
    %c0_i32_0 = arith.constant 0 : i32
    %c0_i32_1 = arith.constant 0 : i32
    return %arg0, %c0_i32, %c0_i32_0 : i32, i32, i32
  }
}

</mosaic_0001>

<bundles_post_ra>
// kernel: tpu_custom_call.1
= control target key start
LH: loop header
LB: loop body
LE: loop exit
PB: predicated region body
PF: predicated region fallthrough
CT: control target
= control target key end

     0   :  { %s2769_s0 = inlined_call_operand.vmem [shape: f32[2,8,32], index: 0, kind: input, shape index: {}]   ;;  %s2770_s1 = inlined_call_operand.vmem [shape: f32[2,1,32], index: 1, kind: input, shape index: {}]   ;;  %s2771_s2 = inlined_call_operand.vmem [shape: f32[2,1,32], index: 2, kind: input, shape index: {}]   ;;  %s2772_s3 = inlined_call_operand.vmem [shape: bf16[2,32,96], index: 3, kind: input, shape index: {}]   ;;  %s2773_s4 = inlined_call_operand.vmem [shape: f32[2,1,96], index: 4, kind: input, shape index: {}]   ;;  %s2774_s5 = inlined_call_operand.vmem [shape: bf16[2,4,8,32], index: 5, kind: input, shape index: {}]   ;;  %s2775_s6 = inlined_call_operand.vmem [shape: f32[2,1,32], index: 6, kind: input, shape index: {}]   ;;  %s2776_s7 = inlined_call_operand.vmem [shape: f32[2,1,32], index: 7, kind: input, shape index: {}]   ;;  %s2777_s8 = inlined_call_operand.vmem [shape: f32[2,1,32], index: 8, kind: input, shape index: {}]   ;;  %s2778_s9 = inlined_call_operand.vmem [shape: bf16[2,32,128], index: 9, kind: input, shape index: {}]   ;;  %s2779_s10 = inlined_call_operand.vmem [shape: f32[2,1,128], index: 10, kind: input, shape index: {}]   ;;  %s2780_s11 = inlined_call_operand.vmem [shape: bf16[2,128,32], index: 11, kind: input, shape index: {}]   ;;  %s2781_s12 = inlined_call_operand.vmem [shape: f32[2,1,32], index: 12, kind: input, shape index: {}]   ;;  %s2782_s13 = inlined_call_operand.hbm [shape: f32[2,8,32], index: 13, kind: output, shape index: {}]  }
   0x1   :  { %2798 = sst [smem:[#allocation22_spill]] %s2769_s0 }
   0x2   :  { %2799 = sst [smem:[#allocation23_spill]] %s2772_s3 }
   0x3   :  { %2800 = sst [smem:[#allocation24_spill]] %s2774_s5 }
   0x4   :  { %2801 = sst [smem:[#allocation25_spill]] %s2776_s7 }
   0x5   :  { %2802 = sst [smem:[#allocation26_spill]] %s2780_s11 }
   0x6   :  { %2803 = sst [smem:[#allocation27_spill]] %s2782_s13 }
   0x7   :  { %18 = vsyncpa [#allocation7], 0 }
   0x8   :  { %20 = vsyncpa [#allocation7 + $0x1], 0  ;;  %s2384_s25 = smov 0   ;;  %s2386_s26 = smov 0  }
   0x9   :  { %s2388_s27 = smov 0   ;;  %s2390_s28 = smov 0  }
   0xa   :  { %s2392_s29 = smov 0   ;;  %s2394_s30 = smov 0  }
   0xb   :  { %s2396_s14 = smov 0   ;;  %s2398_s15 = smov 0  }
   0xc LB: > { %2804 = sst [smem:[#allocation9_spill]] %s2269_s25  ;;  %s1873_s16 = sadd.s32 4294967295, %s2297_s15   ;;  %s2297_s15 = sphi %s2398_s15, %s26_s15   ;;  %s2293_s14 = sphi %s2396_s14, %s2845_s14   ;;  %s2289_s30 = sphi %s2394_s30, %s2844_s30   ;;  %s2285_s29 = sphi %s2392_s29, %s2843_s29   ;;  %s2281_s28 = sphi %s2390_s28, %s2842_s28   ;;  %s2277_s27 = sphi %s2388_s27, %s2841_s27   ;;  %s2273_s26 = sphi %s2386_s26, %s2840_s26   ;;  %s2269_s25 = sphi %s2384_s25, %s2839_s25  }
   0xd   : > { %2805 = sst [smem:[#allocation10_spill]] %s2273_s26  ;;  %s1874_s17 = sadd.s32 4294967294, %s2297_s15  }
   0xe   : > { %2806 = sst [smem:[#allocation11_spill]] %s2277_s27  ;;  %s35_s18 = sadd.s32 1, %s2289_s30 }
   0xf   : > { %2807 = sst [smem:[#allocation12_spill]] %s2281_s28  ;;  %p36_p0 = scmp.ge.s32.totalorder %s35_s18, 2 }
  0x10   : > { %2808 = sst [smem:[#allocation13_spill]] %s2285_s29  ;;  %s38_s19 = sadd.s32 1, %s2293_s14 }
  0x11   : > { %2809 = sst [smem:[#allocation14_spill]] %s2289_s30  ;;  %p393_p1 = scmp.ne.s32.totalorder %s2277_s27, %s2273_s26 }
  0x12   : > { %2810 = sst [smem:[#allocation15_spill]] %s2293_s14  ;;  %p394_p2 = scmp.eq.s32.totalorder %s1873_s16, 3 }
  0x13   : > { %2811 = sst [smem:[#allocation16_spill]] %s2297_s15  ;;  %s2847_s18 = smov (%p36_p0, %s35_s18), 0 }
  0x14   : > { %2812 = sst [smem:[#allocation17_spill]] %s2847_s18  ;;  %s2849_s19 = smov (!%p36_p0, %s38_s19), %s2293_s14 }
  0x15   : > { %p2433_p3 = por %p394_p2, %p393_p1  ;;  %p399_p4 = scmp.ne.s32.totalorder %s2273_s26, %s2269_s25 }
  0x16   : > { %p40_p5 = scmp.ge.s32.totalorder %s2849_s19, 2  ;;  %p400_p6 = scmp.eq.s32.totalorder %s1874_s17, 3 }
  0x17   : > { %s2813_s20 = scalar_select %p2433_p3, 1, 0 }
  0x18   : > { %p1877_p7 = scmp.ge.s32.totalorder %s2297_s15, 1  ;;  %p505_p8 = scmp.lt.s32.totalorder %s2297_s15, 5 }
  0x19   : > { %2814 = sst [smem:[#allocation18_spill]] %s2813_s20  ;;  %s2851_s19 = smov (%p40_p5, %s2849_s19), 0 }
  0x1a   : > { %2815 = sst [smem:[#allocation19_spill]] %s2851_s19  ;;  %p2443_p9 = por %p400_p6, %p399_p4 }
  0x1b   : > { %p506_p10 = pnand %p1877_p7, %p505_p8  ;;  %s380_s22 = ssub.s32 %s2293_s14, %s2851_s19 }
  0x1c   : > { %s2816_s21 = scalar_select %p2443_p9, 1, 0 }
  0x1d   : > { %s383_s23 = sadd.s32 1, %s2277_s27  ;;  %p381_p11 = scmp.eq.s32.totalorder %s380_s22, 0 }
  0x1e   : > { %2817 = sst [smem:[#allocation20_spill]] %s2816_s21  ;;  %509 = sbr.rel (%p506_p10) target bundleno = 2414 (0x96e), region = 72 }
  0x1f   : > { %s2451_s24 = scalar_select %p381_p11, %s2277_s27, %s383_s23  }
  0x20   : > { %s2786_s16 = sand.u32 (!%p506_p10), 1, %s2273_s26   ;;  %p592_p12 = scmp.lt.s32.totalorder (!%p506_p10), %s2285_s29, 1 }
  0x21   : > { %2818 = sst [smem:[#allocation21_spill]] %s2451_s24  ;;  %s1878_s17 = sshll.u32 (!%p506_p10), %s2786_s16, 3 }
  0x22   : > { %p596_p13 = scmp.lt.s32.totalorder (!%p506_p10), %s2281_s28, 1  ;;  %s2819_s0 = sld [smem:[#allocation22_spill]] (!%p506_p10) }
  0x23   : > { %s593_s18 = scalar_select %p592_p12, %s2285_s29, 1 }
  0x24   : > { %s2460_s30 = scalar_select %p596_p13, %s2281_s28, 1 }
  0x25   : > { %s1879_s22 = sshll.u32 %s593_s18, 3  ;;  %s2820_s3 = sld [smem:[#allocation23_spill]] }
  0x26   : > { %s1932_s13 = sshll.u32 %s2460_s30, 4  ;;  %s2821_s5 = sld [smem:[#allocation24_spill]] }
  0x27   : > { %s2503_s18 = scalar_lea.vmem %s2778_s9, %s1932_s13  ;;  %s631_s11 = scalar_lea.vmem %s2779_s10, %s2460_s30 }
  0x28   : > { %s595_s14 = scalar_lea.vmem %s2819_s0, %s1879_s22  ;;  %s623_s0 = scalar_lea.vmem %s2777_s8, %s2460_s30 }
  0x29   : > { %s639_s25 = scalar_lea.vmem %s2781_s12, %s2460_s30  ;;  %s2823_s27 = sld [smem:[#allocation26_spill]] }
  0x2a   : > { %s2519_s26 = scalar_lea.vmem [#allocation6], %s1878_s17  ;;  %s2824_s20 = sld [smem:[#allocation12_spill]] }
  0x2b   : > { %s2477_s29 = scalar_lea.vmem %s2820_s3, %s1932_s13 }
  0x2c   : > { %s2486_s23 = scalar_lea.vmem %s2821_s5, %s1932_s13  ;;  %s1935_s5 = sshll.u32 %s2460_s30, 6 }
  0x2f   : > { %s2517_s7 = scalar_lea.vmem %s2823_s27, %s1935_s5 }
  0x30   : > { %p1888_p0 = scmp.ne.s32.totalorder %s2824_s20, 0 }
  0x32   : > { %644 = sbr.rel (%p1888_p0) target bundleno = 62 (0x3e), region = 76 }
  0x37   : > { %v645_v0 = vld [vmem:[%s595_s14] sm:$0xff]  ;;  %vm646_vm0 = vcmask 261120   ;;  %v648_v1 = vlaneseq  ;;  %vm654_vm1 = vcmask 64512   ;;  %v2299_v4 = vmov -1e+09  }
  0x38   : > { %647 = vst.msk [vmem:[%s2519_s26] sm:$0xff] %vm646_vm0, %v645_v0 }
  0x39   : > { %v649_v2 = vshrl.u32 %v648_v1, 7  ;;  %v651_v3 = vand.u32 127, %v648_v1 }
  0x3b   : > { %vm652_vm2 = vcmp.le.s32.totalorder %v651_v3, %v649_v2 }
  0x3c   : > { %v653_v5 = vsel %vm652_vm2, 0.0, %v2299_v4 }
  0x3d   : > { %655 = vst.msk [vmem:[#allocation5] sm:$0xff] %vm654_vm1, %v653_v5 }
  0x3e PF: > { %vm659_vm3 = vcmask 261120   ;;  %v2169_v13 = vld [vmem:[%s2477_s29 + $0x8] sm:$0xff]   ;;  %v2300_v14 = vmov 0.0   ;;  %vm2301_vm4 = vmmov 0   ;;  %v2170_v15 = vld [vmem:[%s2477_s29] sm:$0xff]   ;;  %s2825_s13 = scalar_lea.vmem %s2770_s1, %s2460_s30  ;;  %s2826_s14 = scalar_lea.vmem %s2771_s2, %s2460_s30  ;;  %vm756_vm5 = vcmask 60416  }
  0x3f   : > { %v2524_v6 = vld [vmem:[%s2519_s26] sm:$0xff]  ;;  %1976 = vmatprep.subr.bf16.mxu1 %v2300_v14  ;;  %1980 = vmatprep.mubr.msk.bf16.mxu1 %vm2301_vm4, %v2300_v14  ;;  %s2827_s19 = scalar_lea.vmem %s2773_s4, %s2460_s30  ;;  %s2302_s22 = smov 120   ;;  %vm827_vm6 = vcmask 64512   ;;  %vm1063_vm7 = vcmask 1043456  }
  0x40   : > { %v660_v7 = vsel %vm659_vm3, %v2524_v6, 0.0  ;;  %1977 = vmatpush3.bf16.msra.mxu1 %v2169_v13  ;;  %2002 = vmatprep.subr.bf16.mxu0 %v2300_v14  ;;  %v1889_v20 = vld [vmem:[%s2825_s13] ss:$0 sm:$0xff]  ;;  %s2303_s24 = smov 96   ;;  %s2304_s16 = smov 88  }
  0x41   : > { %661 = vadd.xlane.f32.xlu0 %v660_v7  ;;  %1978 = vmatprep.subr.bf16.mxu1 %v2300_v14  ;;  %v1890_v22 = vld [vmem:[%s2826_s14] ss:$0 sm:$0xff]  ;;  %s2305_s15 = smov 80   ;;  %s2306_s21 = smov 72  }
  0x42   : > { %2004 = vmatprep.mubr.msk.bf16.mxu0 %vm2301_vm4, %v2300_v14  ;;  %v1891_v26 = vld [vmem:[%s2827_s19] ss:$0 sm:$0xff]  ;;  %s2307_s20 = smov 112   ;;  %s2308_s3 = smov 104  }
  0x43   : > { %s2309_s5 = smov 64   ;;  %s2310_s13 = smov 48  }
  0x44   : > { %1979 = vmatpush3.bf16.msra.mxu1 %v2170_v15  ;;  %v826_v52 = vld [vmem:[#allocation5] sm:$0xff]  ;;  %s2311_s27 = smov 56   ;;  %s2312_s29 = smov 40  }
  0x45   : > { %1984 = vmatprep.subr.bf16.mxu1 %v2300_v14  ;;  %s2828_s17 = scalar_lea.vmem %s2775_s6, %s2460_s30  ;;  %s2313_s28 = smov [#allocation6]  }
  0x46   : > { %s2209_s19 = sshll.u32 %s2313_s28, 4  ;;  %s2210_s19 = int_to_ptr.vmem [resolvable:$false] %s2209_s19 }
  0xca   : > { %v662_v8 = vpop.xlane.xlu0 %661 }
  0xcb   : > { %v664_v9 = vmul.f32 0.03125, %v662_v8 }
  0xcd   : > { %v665_v10 = vsub.f32 %v2524_v6, %v664_v9 }
  0xcf   : > { %v666_v11 = vmul.f32 %v665_v10, %v665_v10 }
  0xd1   : > { %v667_v12 = vsel %vm659_vm3, %v666_v11, 0.0 }
  0xd2   : > { %668 = vadd.xlane.f32.xlu0 %v667_v12 }
 0x15b   : > { %v669_v16 = vpop.xlane.xlu0 %668 }
 0x15c   : > { %v670_v17 = vmul.f32 0.03125, %v669_v16 }
 0x15e   : > { %v671_v18 = vadd.f32 1e-05, %v670_v17 }
 0x160   : > { %2181 = vrsqrt.f32 %v671_v18 }
 0x16d   : > { %v2182_v19 = vpop.eup %2181 }
 0x16e   : > { %v673_v21 = vmul.f32 %v2182_v19, %v665_v10 }
 0x170   : > { %v680_v23 = vmul.f32 %v1889_v20, %v673_v21 }
 0x172   : > { %v687_v24 = vadd.f32 %v1890_v22, %v680_v23 }
 0x174   : > { %v688_v25 = vpack.c.bf16 %v687_v24, %v687_v24 }
 0x176   : > { %1981 = vmatmul.mubr.msk.bf16.vlgmr.msra.gmra.mxu1 %vm659_vm3, %v688_v25 }
 0x177   : > { %1986 = vmatprep.mubr.msk.bf16.mxu1 %vm2301_vm4, %v2300_v14 }
 0x236   : > { %v749_v27 = vpop.f32.mrf.mxu1 }
 0x237   : > { %v750_v28 = vadd.f32 %v1891_v26, %v749_v27 }
 0x238   : > { %v1982_v29 = vpop.f32.mrf.mxu1 }
 0x239   : > { %v2558_v30 = vpack.c.bf16 %v750_v28, %v750_v28 }
 0x23a   : > { %v752_v31 = vpop.f32.mrf.mxu1 }
 0x23b   : > { %769 = vrot.lane.b32.xlu0 %v2558_v30, %s2302_s22  ;;  %761 = vrot.lane.b32.xlu1 %v2558_v30, %s2303_s24  ;;  %757 = vst.msk [vmem:[#allocation2] sm:$0xf] %vm756_vm5, %v2558_v30  ;;  %s2829_s22 = sld [smem:[#allocation25_spill]] }
 0x23c   : > { %v1983_v32 = vpop.f32.mrf.mxu1 }
 0x23f   : > { %774 = vrot.lane.b32.xlu1 %v2558_v30, %s2304_s16 }
 0x241   : > { %s2830_s24 = scalar_lea.vmem %s2829_s22, %s2460_s30  ;;  %s2211_s22 = scalar_lea.vmem %s2210_s19, 256 }
 0x242   : > { %v814_v42 = vld [vmem:[#allocation2] sm:$0xf] }
 0x243   : > { %789 = vrot.lane.b32.xlu1 %v2558_v30, %s2305_s15 }
 0x247   : > { %804 = vrot.lane.b32.xlu1 %v2558_v30, %s2306_s21  ;;  %s2831_s21 = sld [smem:[#allocation13_spill]] }
 0x24b   : > { %784 = vrot.lane.b32.xlu1 %v2558_v30, %s2307_s20 }
 0x24f   : > { %799 = vrot.lane.b32.xlu1 %v2558_v30, %s2308_s3 }
 0x2ad   : > { %v770_v33 = vpop.permute.xlu0 %769  ;;  %v762_v34 = vpop.permute.xlu1 %761 }
 0x2ae   : > { %773 = vst.msk [vmem:[#allocation2 + $0x4] sm:$0xf] %vm756_vm5, %v770_v33  ;;  %764 = vst.msk [vmem:[#allocation3] sm:$0xf] %vm756_vm5, %v762_v34 }
 0x2b1   : > { %v775_v35 = vpop.permute.xlu1 %774 }
 0x2b2   : > { %778 = vst.msk [vmem:[#allocation3 + $0x4] sm:$0xf] %vm756_vm5, %v775_v35 }
 0x2b5   : > { %v790_v36 = vpop.permute.xlu1 %789  ;;  %v818_v37 = vld [vmem:[#allocation3] sm:$0xf]  ;;  %v815_v48 = vld [vmem:[#allocation2 + $0x4] sm:$0xf] }
 0x2b6   : > { %793 = vst.msk [vmem:[#allocation3 + $0x8] sm:$0xf] %vm756_vm5, %v790_v36  ;;  %v832_v38 = vsel %vm827_vm6, %v818_v37, 0 }
 0x2b7   : > { %1985 = vmatpush3.bf16.xpose.msra.mxu1 %v832_v38 }
 0x2b8   : > { %1990 = vmatprep.subr.bf16.mxu1 %v2300_v14 }
 0x2b9   : > { %v805_v39 = vpop.permute.xlu1 %804  ;;  %v819_v40 = vld [vmem:[#allocation3 + $0x4] sm:$0xf] }
 0x2ba   : > { %808 = vst.msk [vmem:[#allocation3 + $0xc] sm:$0xf] %vm756_vm5, %v805_v39  ;;  %v878_v43 = vsel %vm827_vm6, %v819_v40, 0 }
 0x2bd   : > { %v785_v41 = vpop.permute.xlu1 %784  ;;  %v820_v47 = vld [vmem:[#allocation3 + $0x8] sm:$0xf] }
 0x2be   : > { %788 = vst.msk [vmem:[#allocation2 + $0x8] sm:$0xf] %vm756_vm5, %v785_v41  ;;  %1987 = vmatmul.mubr.msk.bf16.vlgmr.msra.gmra.mxu1 %vm827_vm6, %v814_v42  ;;  %v924_v49 = vsel %vm827_vm6, %v820_v47, 0 }
 0x2bf   : > { %1991 = vmatpush3.bf16.xpose.msra.mxu1 %v878_v43  ;;  %1992 = vmatprep.mubr.msk.bf16.mxu1 %vm2301_vm4, %v2300_v14 }
 0x2c0   : > { %1996 = vmatprep.subr.bf16.mxu1 %v2300_v14 }
 0x2c1   : > { %v800_v44 = vpop.permute.xlu1 %799  ;;  %v821_v45 = vld [vmem:[#allocation3 + $0xc] sm:$0xf] }
 0x2c2   : > { %803 = vst.msk [vmem:[#allocation2 + $0xc] sm:$0xf] %vm756_vm5, %v800_v44  ;;  %v970_v46 = vsel %vm827_vm6, %v821_v45, 0 }
 0x2c3   : > { %2003 = vmatpush3.bf16.xpose.msra.mxu0 %v970_v46 }
 0x2c4   : > { %2014 = vmatprep.subr.bf16.mxu0 %v2300_v14 }
 0x2c5   : > { %v816_v51 = vld [vmem:[#allocation2 + $0x8] sm:$0xf] }
 0x2c6   : > { %1993 = vmatmul.mubr.msk.bf16.vlgmr.msra.gmra.mxu1 %vm827_vm6, %v815_v48 }
 0x2c7   : > { %1997 = vmatpush3.bf16.xpose.msra.mxu1 %v924_v49  ;;  %1998 = vmatprep.mubr.msk.bf16.mxu1 %vm2301_vm4, %v2300_v14 }
 0x2c8   : > { %2008 = vmatprep.subr.bf16.mxu1 %v2300_v14 }
 0x2c9   : > { %v817_v50 = vld [vmem:[#allocation2 + $0xc] sm:$0xf] }
 0x2ca   : > { %2005 = vmatmul.mubr.msk.bf16.vlgmr.msra.gmra.mxu0 %vm827_vm6, %v817_v50 }
 0x2cb   : > { %2016 = vmatprep.mubr.msk.bf16.mxu0 %vm2301_vm4, %v2300_v14 }
 0x2ce   : > { %1999 = vmatmul.mubr.msk.bf16.vlgmr.msra.gmra.mxu1 %vm827_vm6, %v816_v51 }
 0x2cf   : > { %2010 = vmatprep.mubr.msk.bf16.mxu1 %vm2301_vm4, %v2300_v14 }
 0x37e   : > { %v868_v53 = vpop.f32.mrf.mxu1 }
 0x37f   : > { %v869_v54 = vadd.f32 %v868_v53, %v826_v52 }
 0x380   : > { %v1988_v55 = vpop.f32.mrf.mxu1 }
 0x381   : > { %v1012_v56 = vsel %vm827_vm6, %v869_v54, -inf }
 0x382   : > { %1013 = vmax.xlane.f32.xlu1 %v1012_v56  ;;  %v871_v57 = vpop.f32.mrf.mxu1 }
 0x384   : > { %v1989_v58 = vpop.f32.mrf.mxu1 }
 0x386   : > { %v914_v59 = vpop.f32.mrf.mxu1 }
 0x387   : > { %v915_v60 = vadd.f32 %v914_v59, %v826_v52 }
 0x388   : > { %v1994_v61 = vpop.f32.mrf.mxu1 }
 0x389   : > { %v1015_v62 = vsel %vm827_vm6, %v915_v60, -inf }
 0x38a   : > { %v1006_v63 = vpop.f32.mrf.mxu0  ;;  %1016 = vmax.xlane.f32.xlu0 %v1015_v62  ;;  %v917_v0 = vpop.f32.mrf.mxu1 }
 0x38b   : > { %v1007_v1 = vadd.f32 %v1006_v63, %v826_v52  ;;  %v1249_v63 = vld [vmem:[%s2486_s23] sm:$0xf] }
 0x38c   : > { %v1995_v2 = vpop.f32.mrf.mxu1  ;;  %v2006_v3 = vpop.f32.mrf.mxu0  ;;  %v1302_v0 = vsel %vm1063_vm7, %v1249_v63, 0 }
 0x38d   : > { %v1021_v4 = vsel %vm827_vm6, %v1007_v1, -inf  ;;  %v1909_v3 = vld [vmem:[%s2486_s23 + $0xc] sm:$0xf] }
 0x38e   : > { %v1009_v5 = vpop.f32.mrf.mxu0  ;;  %1022 = vmax.xlane.f32.xlu0 %v1021_v4  ;;  %v960_v7 = vpop.f32.mrf.mxu1 }
 0x38f   : > { %v961_v8 = vadd.f32 %v960_v7, %v826_v52  ;;  %v1399_v7 = vsel %vm1063_vm7, %v1909_v3, 0 }
 0x390   : > { %v2000_v9 = vpop.f32.mrf.mxu1  ;;  %v2007_v10 = vpop.f32.mrf.mxu0 }
 0x391   : > { %v1018_v11 = vsel %vm827_vm6, %v961_v8, -inf }
 0x392   : > { %1019 = vmax.xlane.f32.xlu1 %v1018_v11  ;;  %v963_v12 = vpop.f32.mrf.mxu1  ;;  %v1907_v11 = vld [vmem:[%s2486_s23 + $0x8] sm:$0xf] }
 0x394   : > { %v2001_v13 = vpop.f32.mrf.mxu1 }
 0x3a3   : > { %765 = vrot.lane.b32.xlu1 %v2558_v30, %s2309_s5  ;;  %s1929_s5 = sshll.u32 %s2831_s21, 7 }
 0x40b   : > { %v1014_v15 = vpop.xlane.xlu1 %1013 }
 0x40c   : > { %v1024_v16 = vsub.f32 %v869_v54, %v1014_v15  ;;  %v1350_v15 = vsel %vm1063_vm7, %v1907_v11, 0  ;;  %v2179_v11 = vld [vmem:[%s2517_s7 + $0x8] sm:$0xff]  }
 0x40e   : > { %v1028_v17 = vmul.f32 1.442695, %v1024_v16 }
 0x410   : > { %2183 = vpow2.f32 %v1028_v17 }
 0x413   : > { %v1017_v18 = vpop.xlane.xlu0 %1016 }
 0x414   : > { %v1025_v19 = vsub.f32 %v915_v60, %v1017_v18 }
 0x416   : > { %v1030_v22 = vmul.f32 1.442695, %v1025_v19 }
 0x417   : > { %v1023_v20 = vpop.xlane.xlu0 %1022 }
 0x418   : > { %v1027_v21 = vsub.f32 %v1007_v1, %v1023_v20  ;;  %v1904_v1 = vld [vmem:[%s2486_s23 + $0x4] sm:$0xf]  ;;  %s2834_s23 = sld [smem:[#allocation27_spill]] }
 0x419   : > { %v1256_v2 = vsel %vm1063_vm7, %v1904_v1, 0 }
 0x41a   : > { %v1034_v23 = vmul.f32 1.442695, %v1027_v21 }
 0x41b   : > { %v1020_v24 = vpop.xlane.xlu1 %1019 }
 0x41c   : > { %2185 = vpow2.f32 %v1034_v23  ;;  %v1026_v35 = vsub.f32 %v961_v8, %v1020_v24 }
 0x41d   : > { %v2184_v25 = vpop.eup %2183  ;;  %2187 = vpow2.f32 %v1030_v22 }
 0x41e   : > { %v1036_v26 = vsel %vm827_vm6, %v2184_v25, 0.0  ;;  %v1032_v36 = vmul.f32 1.442695, %v1026_v35  ;;  %s2713_s14 = scalar_lea.hbm %s2834_s23, %s1929_s5 }
 0x41f   : > { %1037 = vadd.xlane.f32.xlu1 %v1036_v26  ;;  %v766_v27 = vpop.permute.xlu1 %765 }
 0x420   : > { %768 = vst.msk [vmem:[#allocation4] sm:$0xf] %vm756_vm5, %v766_v27  ;;  %2189 = vpow2.f32 %v1032_v36 }
 0x427   : > { %v822_v28 = vld [vmem:[#allocation4] sm:$0xf] }
 0x428   : > { %v1065_v29 = vsel %vm1063_vm7, %v822_v28, 0 }
 0x429   : > { %v2186_v31 = vpop.eup %2185  ;;  %2009 = vmatpush3.bf16.msra.mxu1 %v1065_v29 }
 0x42a   : > { %v1045_v32 = vsel %vm827_vm6, %v2186_v31, 0.0  ;;  %2020 = vmatprep.subr.bf16.mxu1 %v2300_v14  ;;  %v2188_v33 = vpop.eup %2187 }
 0x42b   : > { %1046 = vadd.xlane.f32.xlu0 %v1045_v32  ;;  %v1039_v34 = vsel %vm827_vm6, %v2188_v33, 0.0 }
 0x42d   : > { %v2190_v37 = vpop.eup %2189 }
 0x42e   : > { %v1042_v38 = vsel %vm827_vm6, %v2190_v37, 0.0 }
 0x42f   : > { %1040 = vadd.xlane.f32.xlu0 %v1039_v34 }
 0x430   : > { %794 = vrot.lane.b32.xlu1 %v2558_v30, %s2310_s13  ;;  %s1683_s13 = sshll.u32 %s2519_s26, 4  ;;  %s2715_s13 = int_to_ptr.vmem [resolvable:$true] %s1683_s13 }
 0x431   : > { %p2212_p5 = scmp.lt.s32.totalorder %s2715_s13, %s2210_s19 }
 0x445   : > { %779 = vrot.lane.b32.xlu0 %v2558_v30, %s2311_s27 }
 0x454   : > { %1043 = vadd.xlane.f32.xlu1 %v1042_v38 }
 0x465   : > { %809 = vrot.lane.b32.xlu1 %v2558_v30, %s2312_s29 }
 0x4a8   : > { %v1038_v39 = vpop.xlane.xlu1 %1037 }
 0x4a9   : > { %2191 = vrcp.f32 %v1038_v39 }
 0x4ac   : > { %v795_v40 = vpop.permute.xlu1 %794 }
 0x4ad   : > { %798 = vst.msk [vmem:[#allocation4 + $0x8] sm:$0xf] %vm756_vm5, %v795_v40 }
 0x4b4   : > { %v1047_v41 = vpop.xlane.xlu0 %1046  ;;  %v824_v45 = vld [vmem:[#allocation4 + $0x8] sm:$0xf] }
 0x4b5   : > { %v1157_v47 = vsel %vm1063_vm7, %v824_v45, 0 }
 0x4b6   : > { %v2192_v42 = vpop.eup %2191 }
 0x4b7   : > { %v1052_v43 = vmul.f32 %v2192_v42, %v2184_v25 }
 0x4b8   : > { %v1041_v44 = vpop.xlane.xlu0 %1040 }
 0x4b9   : > { %2193 = vrcp.f32 %v1041_v44  ;;  %v1056_v46 = vpack.c.bf16 %v1052_v43, %v1052_v43  ;;  %v1911_v43 = vld [vmem:[%s2828_s17] ss:$0 sm:$0xff]  ;;  %s2205_s17 = scalar_lea.vmem %s2715_s13, 128 }
 0x4ba   : > { %2195 = vrcp.f32 %v1047_v41  ;;  %p2206_p1 = scmp.ne.s32.totalorder %s2715_s13, %s2205_s17  ;;  %p2213_p6 = scmp.lt.s32.totalorder %s2211_s22, %s2205_s17 }
 0x4bb   : > { %2011 = vmatmul.mubr.msk.bf16.vlgmr.msra.gmra.mxu1 %vm827_vm6, %v1056_v46 }
 0x4bc   : > { %2021 = vmatpush3.bf16.msra.mxu1 %v1157_v47  ;;  %v780_v48 = vpop.permute.xlu0 %779  ;;  %2022 = vmatprep.mubr.msk.bf16.mxu1 %vm2301_vm4, %v2300_v14  ;;  %p2207_p2 = pnand %p2206_p1, %p2433_p3  ;;  %p2214_p7 = por %p2213_p6, %p2212_p5 }
 0x4bd   : > { %783 = vst.msk [vmem:[#allocation4 + $0x4] sm:$0xf] %vm756_vm5, %v780_v48  ;;  %2032 = vmatprep.subr.bf16.mxu1 %v2300_v14 }
 0x4be   : > { %p2208_p4 = pneg %p2207_p2 }
 0x4c0   : > { %p2215_p8 = pnand %p2214_p7, %p2208_p4 }
 0x4c4   : > { %v823_v30 = vld [vmem:[#allocation4 + $0x4] sm:$0xf] }
 0x4c5   : > { %v1111_v49 = vsel %vm1063_vm7, %v823_v30, 0 }
 0x4c6   : > { %v2194_v50 = vpop.eup %2193  ;;  %2015 = vmatpush3.bf16.msra.mxu0 %v1111_v49 }
 0x4c7   : > { %v1053_v51 = vmul.f32 %v2194_v50, %v2188_v33  ;;  %2026 = vmatprep.subr.bf16.mxu0 %v2300_v14  ;;  %v2196_v55 = vpop.eup %2195 }
 0x4c8   : > { %v1055_v56 = vmul.f32 %v2196_v55, %v2186_v31 }
 0x4c9   : > { %v1057_v52 = vpack.c.bf16 %v1053_v51, %v1053_v51 }
 0x4ca   : > { %v1059_v60 = vpack.c.bf16 %v1055_v56, %v1055_v56 }
 0x4cb   : > { %2017 = vmatmul.mubr.msk.bf16.vlgmr.msra.gmra.mxu0 %vm827_vm6, %v1057_v52 }
 0x4cc   : > { %2028 = vmatprep.mubr.msk.bf16.mxu0 %vm2301_vm4, %v2300_v14 }
 0x4dd   : > { %v1044_v53 = vpop.xlane.xlu1 %1043 }
 0x4de   : > { %2197 = vrcp.f32 %v1044_v53 }
 0x4e1   : > { %v810_v54 = vpop.permute.xlu1 %809 }
 0x4e2   : > { %813 = vst.msk [vmem:[#allocation4 + $0xc] sm:$0xf] %vm756_vm5, %v810_v54 }
 0x4e9   : > { %v825_v57 = vld [vmem:[#allocation4 + $0xc] sm:$0xf] }
 0x4ea   : > { %v1203_v58 = vsel %vm1063_vm7, %v825_v57, 0  ;;  %v2171_v57 = vld [vmem:[%s2503_s18 + $0x8] sm:$0xff]  }
 0x4eb   : > { %v2198_v59 = vpop.eup %2197  ;;  %2027 = vmatpush3.bf16.msra.mxu0 %v1203_v58  ;;  %v2172_v58 = vld [vmem:[%s2503_s18] sm:$0xff]  }
 0x4ec   : > { %v1054_v61 = vmul.f32 %v2198_v59, %v2190_v37  ;;  %2038 = vmatprep.subr.bf16.mxu0 %v2300_v14 }
 0x4ee   : > { %2029 = vmatmul.mubr.msk.bf16.vlgmr.msra.gmra.mxu0 %vm827_vm6, %v1059_v60  ;;  %v1058_v62 = vpack.c.bf16 %v1054_v61, %v1054_v61 }
 0x4ef   : > { %2040 = vmatprep.mubr.msk.bf16.mxu0 %vm2301_vm4, %v2300_v14  ;;  %2039 = vmatpush3.bf16.msra.mxu0 %v1302_v0  ;;  %v1913_v0 = vld [vmem:[%s623_s0] ss:$0 sm:$0xff] }
 0x4f0   : > { %2023 = vmatmul.mubr.msk.bf16.vlgmr.msra.gmra.mxu1 %vm827_vm6, %v1058_v62  ;;  %2050 = vmatprep.subr.bf16.mxu0 %v2300_v14  ;;  %v1912_v62 = vld [vmem:[%s2830_s24] ss:$0 sm:$0xff] }
 0x4f1   : > { %2034 = vmatprep.mubr.msk.bf16.mxu1 %vm2301_vm4, %v2300_v14  ;;  %2033 = vmatpush3.bf16.msra.mxu1 %v1256_v2 }
 0x4f2   : > { %2044 = vmatprep.subr.bf16.mxu1 %v2300_v14 }
 0x57b   : > { %v1101_v4 = vpop.f32.mrf.mxu1 }
 0x57c   : > { %v1245_v5 = vpack.c.bf16 %v1101_v4, %v1101_v4  ;;  %v2173_v4 = vld [vmem:[%s2517_s7 + $0x38] sm:$0xff]  }
 0x57d   : > { %v2012_v8 = vpop.f32.mrf.mxu1 }
 0x57e   : > { %2041 = vmatmul.mubr.msk.bf16.vlgmr.msra.gmra.mxu0 %vm827_vm6, %v1245_v5  ;;  %v2174_v5 = vld [vmem:[%s2517_s7 + $0x30] sm:$0xff]   ;;  %v2176_v8 = vld [vmem:[%s2517_s7 + $0x20] sm:$0xff]  }
 0x57f   : > { %v1104_v9 = vpop.f32.mrf.mxu1  ;;  %2051 = vmatpush3.bf16.msra.mxu0 %v1399_v7  ;;  %2052 = vmatprep.mubr.msk.bf16.mxu0 %vm2301_vm4, %v2300_v14  ;;  %v2175_v7 = vld [vmem:[%s2517_s7 + $0x28] sm:$0xff]  }
 0x580   : > { %2064 = vmatprep.subr.bf16.mxu0 %v2300_v14  ;;  %v2177_v9 = vld [vmem:[%s2517_s7 + $0x18] sm:$0xff]  }
 0x581   : > { %v2013_v10 = vpop.f32.mrf.mxu1 }
 0x582   : > { %v2178_v10 = vld [vmem:[%s2517_s7 + $0x10] sm:$0xff]  }
 0x58b   : > { %v1147_v12 = vpop.f32.mrf.mxu0 }
 0x58c   : > { %v1246_v13 = vpack.c.bf16 %v1147_v12, %v1147_v12  ;;  %v2180_v12 = vld [vmem:[%s2517_s7] sm:$0xff]   ;;  %s2832_s7 = sld [smem:[#allocation10_spill]] }
 0x58d   : > { %v2018_v16 = vpop.f32.mrf.mxu0 }
 0x58e   : > { %2035 = vmatmul.mubr.msk.bf16.vlgmr.msra.gmra.mxu1 %vm827_vm6, %v1246_v13  ;;  %v1914_v13 = vld [vmem:[%s631_s11] ss:$0 sm:$0xff] }
 0x58f   : > { %v1150_v17 = vpop.f32.mrf.mxu0  ;;  %2045 = vmatpush3.bf16.msra.mxu1 %v1350_v15  ;;  %2046 = vmatprep.mubr.msk.bf16.mxu1 %vm2301_vm4, %v2300_v14 }
 0x590   : > { %2056 = vmatprep.subr.bf16.mxu1 %v2300_v14 }
 0x591   : > { %v2019_v18 = vpop.f32.mrf.mxu0 }
 0x592   : > { %s2835_s30 = sand.u32 1, %s2832_s7  }
 0x5ae   : > { %v1239_v19 = vpop.f32.mrf.mxu0 }
 0x5af   : > { %v1248_v20 = vpack.c.bf16 %v1239_v19, %v1239_v19 }
 0x5b0   : > { %v1193_v21 = vpop.f32.mrf.mxu1  ;;  %v2030_v22 = vpop.f32.mrf.mxu0 }
 0x5b1   : > { %v1247_v23 = vpack.c.bf16 %v1193_v21, %v1193_v21  ;;  %2053 = vmatmul.mubr.msk.bf16.vlgmr.msra.gmra.mxu0 %vm827_vm6, %v1248_v20 }
 0x5b2   : > { %v2024_v24 = vpop.f32.mrf.mxu1  ;;  %v1242_v25 = vpop.f32.mrf.mxu0  ;;  %2080 = vmatprep.mubr.msk.bf16.mxu0 %vm2301_vm4, %v2300_v14  ;;  %2065 = vmatpush3.bf16.msra.mxu0 %v2173_v4 }
 0x5b3   : > { %2047 = vmatmul.mubr.msk.bf16.vlgmr.msra.gmra.mxu1 %vm827_vm6, %v1247_v23  ;;  %2066 = vmatprep.subr.bf16.mxu0 %v2300_v14 }
 0x5b4   : > { %v1196_v26 = vpop.f32.mrf.mxu1  ;;  %v2031_v27 = vpop.f32.mrf.mxu0  ;;  %2060 = vmatprep.mubr.msk.bf16.mxu1 %vm2301_vm4, %v2300_v14  ;;  %2057 = vmatpush3.bf16.msra.mxu1 %v2171_v57 }
 0x5b5   : > { %2058 = vmatprep.subr.bf16.mxu1 %v2300_v14  ;;  %v1919_v26 = vld [vmem:[%s639_s25] ss:$0 sm:$0xff]  ;;  %s1670_s25 = scalar_lea.sflag [#allocation7], %s2835_s30 }
 0x5b6   : > { %v2025_v28 = vpop.f32.mrf.mxu1  ;;  %2067 = vmatpush3.bf16.msra.mxu0 %v2174_v5 }
 0x5b7   : > { %2068 = vmatprep.subr.bf16.mxu0 %v2300_v14 }
 0x5b8   : > { %2059 = vmatpush3.bf16.msra.mxu1 %v2172_v58 }
 0x5ba   : > { %2069 = vmatpush3.bf16.msra.mxu0 %v2175_v7 }
 0x5bb   : > { %2070 = vmatprep.subr.bf16.mxu0 %v2300_v14 }
 0x5be   : > { %2071 = vmatpush3.bf16.msra.mxu0 %v2176_v8 }
 0x5bf   : > { %2072 = vmatprep.subr.bf16.mxu0 %v2300_v14 }
 0x5c2   : > { %2073 = vmatpush3.bf16.msra.mxu0 %v2177_v9 }
 0x5c3   : > { %2074 = vmatprep.subr.bf16.mxu0 %v2300_v14 }
 0x5c6   : > { %2075 = vmatpush3.bf16.msra.mxu0 %v2178_v10 }
 0x5c7   : > { %2076 = vmatprep.subr.bf16.mxu0 %v2300_v14 }
 0x5ca   : > { %2077 = vmatpush3.bf16.msra.mxu0 %v2179_v11 }
 0x5cb   : > { %2078 = vmatprep.subr.bf16.mxu0 %v2300_v14 }
 0x5ce   : > { %2079 = vmatpush3.bf16.msra.mxu0 %v2180_v12 }
 0x63e   : > { %v1338_v29 = vpop.f32.mrf.mxu0 }
 0x640   : > { %v2042_v31 = vpop.f32.mrf.mxu0 }
 0x642   : > { %v1341_v32 = vpop.f32.mrf.mxu0 }
 0x644   : > { %v2043_v33 = vpop.f32.mrf.mxu0 }
 0x64e   : > { %v1292_v34 = vpop.f32.mrf.mxu1 }
 0x64f   : > { %v1339_v39 = vadd.f32 %v1338_v29, %v1292_v34 }
 0x650   : > { %v2036_v35 = vpop.f32.mrf.mxu1 }
 0x652   : > { %v1295_v36 = vpop.f32.mrf.mxu1 }
 0x654   : > { %v2037_v37 = vpop.f32.mrf.mxu1 }
 0x671   : > { %v1435_v38 = vpop.f32.mrf.mxu0 }
 0x673   : > { %v1386_v40 = vpop.f32.mrf.mxu1  ;;  %v2054_v41 = vpop.f32.mrf.mxu0 }
 0x674   : > { %v1392_v42 = vadd.f32 %v1386_v40, %v1339_v39 }
 0x675   : > { %v2048_v44 = vpop.f32.mrf.mxu1  ;;  %v1438_v45 = vpop.f32.mrf.mxu0 }
 0x676   : > { %v1441_v46 = vadd.f32 %v1435_v38, %v1392_v42 }
 0x677   : > { %v1389_v47 = vpop.f32.mrf.mxu1  ;;  %v2055_v48 = vpop.f32.mrf.mxu0 }
 0x678   : > { %v1449_v30 = vadd.f32 %v1911_v43, %v1441_v46 }
 0x679   : > { %v2049_v49 = vpop.f32.mrf.mxu1 }
 0x67a   : > { %v2662_v50 = vadd.f32 %v1449_v30, %v2524_v6 }
 0x67c   : > { %v1453_v51 = vsel %vm659_vm3, %v2662_v50, 0.0 }
 0x67d   : > { %1454 = vadd.xlane.f32.xlu0 %v1453_v51 }
 0x706   : > { %v1455_v52 = vpop.xlane.xlu0 %1454 }
 0x707   : > { %v1456_v53 = vmul.f32 0.03125, %v1455_v52 }
 0x709   : > { %v1457_v54 = vsub.f32 %v2662_v50, %v1456_v53 }
 0x70b   : > { %v1458_v55 = vmul.f32 %v1457_v54, %v1457_v54 }
 0x70d   : > { %v1459_v56 = vsel %vm659_vm3, %v1458_v55, 0.0 }
 0x70e   : > { %1460 = vadd.xlane.f32.xlu1 %v1459_v56 }
 0x797   : > { %v1461_v6 = vpop.xlane.xlu1 %1460 }
 0x798   : > { %v1462_v59 = vmul.f32 0.03125, %v1461_v6 }
 0x79a   : > { %v1463_v60 = vadd.f32 1e-05, %v1462_v59 }
 0x79c   : > { %2199 = vrsqrt.f32 %v1463_v60 }
 0x7a9   : > { %v2200_v61 = vpop.eup %2199 }
 0x7aa   : > { %v1465_v63 = vmul.f32 %v2200_v61, %v1457_v54 }
 0x7ac   : > { %v1472_v1 = vmul.f32 %v1912_v62, %v1465_v63 }
 0x7ae   : > { %v1479_v2 = vadd.f32 %v1913_v0, %v1472_v1 }
 0x7b0   : > { %v1480_v3 = vpack.c.bf16 %v1479_v2, %v1479_v2 }
 0x7b2   : > { %2061 = vmatmul.mubr.msk.bf16.vlgmr.msra.gmra.mxu1 %vm659_vm3, %v1480_v3 }
 0x872   : > { %v1541_v15 = vpop.f32.mrf.mxu1 }
 0x873   : > { %v1542_v16 = vadd.f32 %v1914_v13, %v1541_v15 }
 0x874   : > { %v2062_v17 = vpop.f32.mrf.mxu1 }
 0x875   : > { %v1918_v18 = vmul.f32 -1.702, %v1542_v16 }
 0x876   : > { %v1544_v19 = vpop.f32.mrf.mxu1 }
 0x877   : > { %v1549_v20 = vmul.f32 1.442695, %v1918_v18 }
 0x878   : > { %v2063_v21 = vpop.f32.mrf.mxu1 }
 0x879   : > { %2201 = vpow2.f32 %v1549_v20 }
 0x886   : > { %v2202_v22 = vpop.eup %2201 }
 0x887   : > { %v1551_v14 = vadd.f32 1.0, %v2202_v22 }
 0x889   : > { %2203 = vrcp.f32 %v1551_v14 }
 0x896   : > { %v2204_v23 = vpop.eup %2203 }
 0x897   : > { %v1554_v24 = vmul.f32 %v2204_v23, %v1542_v16 }
 0x899   : > { %v1555_v25 = vpack.c.bf16 %v1554_v24, %v1554_v24 }
 0x89b   : > { %2081 = vmatmul.mubr.bf16.vlgmr.msra.gmra.mxu0 %v1555_v25 }
 0x95b   : > { %v1661_v27 = vpop.f32.mrf.mxu0 }
 0x95c   : > { %v1662_v28 = vadd.f32 %v1919_v26, %v1661_v27 }
 0x95d   : > { %v2082_v29 = vpop.f32.mrf.mxu0 }
 0x95e   : > { %v1667_v31 = vadd.f32 %v1662_v28, %v2662_v50 }
 0x95f   : > { %v1664_v32 = vpop.f32.mrf.mxu0 }
 0x960   : > { %1668 = vst.msk [vmem:[%s2519_s26] sm:$0xff] %vm659_vm3, %v1667_v31 }
 0x961   : > { %v2083_v33 = vpop.f32.mrf.mxu0 }
 0x962   : > { %2218 = shalt.err (!%p2215_p8)
}
 0x963   : > { %s2219_s26 = scalar_lea.hbm %s2713_s14, 128  ;;  %s2223_s15 = scalar_lea.hbm %s2834_s23, 256 }
 0x964   : > { %p2220_p10 = scmp.ne.s32.totalorder %s2713_s14, %s2219_s26  ;;  %p2224_p13 = scmp.lt.s32.totalorder %s2713_s14, %s2834_s23 }
 0x965   : > { %p2225_p0 = scmp.lt.s32.totalorder %s2223_s15, %s2219_s26 }
 0x966   : > { %p2221_p11 = pnand %p2220_p10, %p2433_p3 }
 0x967   : > { %p2226_p1 = por %p2225_p0, %p2224_p13 }
 0x968   : > { %p2222_p12 = pneg %p2221_p11 }
 0x96a   : > { %p2227_p2 = pnand %p2226_p1, %p2222_p12 }
 0x96c   : > { %2230 = shalt.err (!%p2227_p2)
}
 0x96d   : > { %2084 = dma.vmem_to_hbm [thread:$0]  (%p2433_p3), %s2715_s13, 128, %s2713_s14, %s1670_s25  }
 0x96e PF: > { %s2836_s21 = sld [smem:[#allocation16_spill]] }
 0x96f   : > { %s2837_s7 = sld [smem:[#allocation9_spill]] }
 0x974   : > { %p2090_p4 = scmp.ge.s32.totalorder %s2836_s21, 2 }
 0x975   : > { %s1695_s20 = sand.u32 1, %s2837_s7  }
 0x976   : > { %p2087_p5 = pnand %p2090_p4, %p2443_p9  ;;  %s1696_s5 = scalar_lea.sflag [#allocation7], %s1695_s20 }
 0x978   : > { %p2088_p6 = pneg %p2087_p5 }
 0x97a   : > { %2264 = dma.done.wait (%p2088_p6), %s1696_s5, 128  }
 0x97b   : > { %2266 = vsyncadd (%p2088_p6), %s1696_s5, 4294967168  ;;  %s26_s15 = sadd.s32 1, %s2836_s21   ;;  %s2839_s25 = sld [smem:[#allocation10_spill]] }
 0x97c   : > { %p23_p7 = scmp.ge.s32.totalorder %s26_s15, 6   ;;  %s2840_s26 = sld [smem:[#allocation11_spill]] }
 0x97d   : > { %s2841_s27 = sld [smem:[#allocation21_spill]] }
 0x97e   : > { %s2842_s28 = sld [smem:[#allocation14_spill]]  ;;  %25 = sbr.rel (!%p23_p7) target bundleno = 12 (0xc), region = 159 }
 0x97f   : > { %s2843_s29 = sld [smem:[#allocation15_spill]] }
 0x980   : > { %s2844_s30 = sld [smem:[#allocation17_spill]] }
 0x981   : > { %s2845_s14 = sld [smem:[#allocation19_spill]] }
 0x983   :  { %1701 = vsyncpa [#allocation7], 1 }
 0x984   :  { %1703 = vsyncpa [#allocation7 + $0x1], 1 }

</bundles_post_ra>
